<compile_context>
chip_gen: v6e
topology: v6e:2x2x1
jax: 0.10.0
libtpu: 0.0.40
codegen_flags: <defaults>
</compile_context>

<pallas_src>
import jax
import jax.numpy as jnp
from jax import lax
from jax.experimental import pallas as pl
from jax.experimental.pallas import tpu as pltpu

_VMEM_LIMIT = 32 * 1024 * 1024     # safe on v5e/v6e (128 MiB phys) and v7x (64 MiB phys)
_TILE_BUDGET = 20 * 1024 * 1024    # per-grid-step working-set target (headroom under limit)


def _round_up(v, m):
    return ((v + m - 1) // m) * m


def _per_step_bytes(bt, L, Cp, Lo_pad):
    """Rough per-grid-step VMEM working set (f32 temporaries, double-buffered blocks)."""
    Lc = L + 2
    Lpad = 2 * Lo_pad + 8
    x_blk = 2 * bt * L * Cp * 4
    w_blk = 2 * 3 * Cp * Cp * 4
    tmp = 8 * bt * Lc * Cp * 4          # circular-pad copies + taps/cols + y/yn/ya values
    pool = Lpad * Cp * 4
    o_blk = 2 * bt * Lo_pad * Cp * 4
    return x_blk + w_blk + tmp + pool + o_blk


def _choose_block_b(B, L, Cp, Lo_pad, cap=16):
    best = 1
    for d in range(1, min(B, cap) + 1):
        if B % d == 0 and _per_step_bytes(d, L, Cp, Lo_pad) <= _TILE_BUDGET:
            best = d
    return best


# -----------------------------------------------------------------------------------
# In-kernel helpers
# -----------------------------------------------------------------------------------
def _stacked_conv(x_ref, w_ref):
    """Circular pad + 3-tap Conv1d for all Bt elements of the block, stacked so the MXU
    sees ONE matmul with M = Bt*(L+2) rows.

      x_ref : (Bt, L, Cp) f32        w_ref : (3*Cp, Cp) f32|bf16 (tap-major rows)
      returns (Bt*(L+2), Cp) f32.
    """
    Bt, L, Cp = x_ref.shape
    Lc = L + 2
    mm_dt = w_ref.dtype
    prec = lax.Precision.HIGHEST if mm_dt == jnp.float32 else None

    xps = []
    for b in range(Bt):                                        # static unroll, Bt <= 16
        xb = x_ref[b]                                          # (L, Cp)
        xps.append(jnp.concatenate([xb[L - 2:L], xb, xb[0:2]], axis=0))   # (L+4, Cp)
    taps = [jnp.concatenate([xp[k:k + Lc] for xp in xps], axis=0)
            for k in range(3)]                                 # 3 x (Bt*Lc, Cp)

    if Cp >= 256:
        # K = Cp already fills the MXU; skip the 3x im2col copy (VMEM footprint).
        y = jnp.dot(taps[0].astype(mm_dt), w_ref[0 * Cp:1 * Cp, :],
                    preferred_element_type=jnp.float32, precision=prec)
        y = y + jnp.dot(taps[1].astype(mm_dt), w_ref[1 * Cp:2 * Cp, :],
                        preferred_element_type=jnp.float32, precision=prec)
        y = y + jnp.dot(taps[2].astype(mm_dt), w_ref[2 * Cp:3 * Cp, :],
                        preferred_element_type=jnp.float32, precision=prec)
        return y
    cols = jnp.concatenate(taps, axis=1).astype(mm_dt)         # (Bt*Lc, 3*Cp) im2col
    return jnp.dot(cols, w_ref[...], preferred_element_type=jnp.float32, precision=prec)


def _elu(v):
    return jnp.where(v > 0, v, jnp.exp(jnp.minimum(v, 0.0)) - 1.0)


def _maxpool_store(ya, o_ref, ypad_ref, Lc):
    """MaxPool1d(kernel=3, stride=2, padding=1) of the stacked activations.

    ypad row 8+j == conv row j (8-row -inf front pad keeps the big store sublane
    aligned); output window t = max over ypad rows {2t+7, 2t+8, 2t+9}.
    """
    Bt, Lo_pad, Cp = o_ref.shape
    Lpad = ypad_ref.shape[0]
    ypad_ref[0:8, :] = jnp.full((8, Cp), -jnp.inf, jnp.float32)
    if Lpad > 8 + Lc:
        ypad_ref[8 + Lc:Lpad, :] = jnp.full((Lpad - 8 - Lc, Cp), -jnp.inf, jnp.float32)
    for b in range(Bt):                                        # static unroll
        ypad_ref[8:8 + Lc, :] = ya[b * Lc:(b + 1) * Lc]
        p0 = ypad_ref[pl.ds(7, Lo_pad, stride=2), :]
        p1 = ypad_ref[pl.ds(8, Lo_pad, stride=2), :]
        p2 = ypad_ref[pl.ds(9, Lo_pad, stride=2), :]
        o_ref[b] = jnp.maximum(jnp.maximum(p0, p1), p2).astype(o_ref.dtype)


# -----------------------------------------------------------------------------------
# Kernels
# -----------------------------------------------------------------------------------
def _stats_kernel(x_ref, w_ref, psum_ref, psq_ref):
    """Pass 1 (two-pass path): conv + per-grid-step partial BN statistics (parallel)."""
    y = _stacked_conv(x_ref, w_ref)                            # (Bt*Lc, Cp) f32
    psum_ref[0] = jnp.sum(y, axis=0, keepdims=True)
    psq_ref[0] = jnp.sum(y * y, axis=0, keepdims=True)


def _apply_kernel(x_ref, w_ref, scale_ref, shift_ref, o_ref, ypad_ref):
    """Pass 2 (two-pass path): conv recompute + folded BN + ELU + max-pool."""
    L = x_ref.shape[1]
    Lc = L + 2
    y = _stacked_conv(x_ref, w_ref)
    ya = _elu(y * scale_ref[...] + shift_ref[...])
    _maxpool_store(ya, o_ref, ypad_ref, Lc)


def _fused_kernel(x_ref, w_ref, gamma_ref, beta_ref, o_ref, ypad_ref):
    """Single-call path: conv once (whole batch resident), centered BN stats,
    folded BN + ELU + max-pool."""
    B, L, _ = x_ref.shape
    Lc = L + 2
    y = _stacked_conv(x_ref, w_ref)                            # (B*Lc, Cp) f32
    inv_n = 1.0 / float(B * Lc)
    mu = jnp.sum(y, axis=0, keepdims=True) * inv_n             # (1, Cp)
    d = y - mu
    var = jnp.sum(d * d, axis=0, keepdims=True) * inv_n        # centered: no cancellation
    scale = gamma_ref[...] * lax.rsqrt(var + 1e-5)
    shift = beta_ref[...] - mu * scale
    ya = _elu(y * scale + shift)
    _maxpool_store(ya, o_ref, ypad_ref, Lc)


# -----------------------------------------------------------------------------------
# Wrapper.  x: (B, L, C).  conv_w: (C_out, C_in, 3) PyTorch Conv1d layout.
# -----------------------------------------------------------------------------------
def conv_layer_forward(x, conv_w, conv_b, gamma, beta, *,
                       use_bf16=False, force_two_pass=False, block_b=None):
    # Conv bias cancels exactly under train-mode BatchNorm (mean subtraction), so it is
    # dropped from the kernels (saves one operand DMA and a full (M, Cp) VPU add).
    del conv_b
    B, L, C = x.shape
    out_dtype = x.dtype
    Lc = L + 2
    Lo = (Lc - 1) // 2 + 1
    Lo_pad = _round_up(Lo, 8)
    Lpad = 2 * Lo_pad + 8
    Cp = _round_up(max(C, 128), 128)                           # lane-dense channels
    wdt = jnp.bfloat16 if use_bf16 else jnp.float32

    w_t = jnp.transpose(conv_w.astype(jnp.float32), (2, 1, 0))  # (3, C_in, C_out)
    if Cp == C:
        # Channels already lane-dense: skip all padding copies (saves an HBM round trip).
        xq = x.astype(jnp.float32)
        w_fused = w_t.reshape(3 * C, C).astype(wdt)
        g_p = gamma.astype(jnp.float32).reshape(1, C)
        b_p = beta.astype(jnp.float32).reshape(1, C)
    else:
        xq = jnp.zeros((B, L, Cp), jnp.float32).at[:, :, :C].set(x.astype(jnp.float32))
        w_fused = (jnp.zeros((3, Cp, Cp), jnp.float32).at[:, :C, :C].set(w_t)
                   .reshape(3 * Cp, Cp).astype(wdt))
        g_p = jnp.zeros((1, Cp), jnp.float32).at[0, :C].set(gamma.astype(jnp.float32))
        b_p = jnp.zeros((1, Cp), jnp.float32).at[0, :C].set(beta.astype(jnp.float32))

    fused_ok = (not force_two_pass and B <= 64
                and _per_step_bytes(B, L, Cp, Lo_pad) <= _TILE_BUDGET)

    if fused_ok:
        out = pl.pallas_call(
            _fused_kernel,
            out_shape=jax.ShapeDtypeStruct((B, Lo_pad, Cp), out_dtype),
            grid=(1,),
            in_specs=[
                pl.BlockSpec((B, L, Cp), lambda i: (0, 0, 0)),
                pl.BlockSpec((3 * Cp, Cp), lambda i: (0, 0)),
                pl.BlockSpec((1, Cp), lambda i: (0, 0)),
                pl.BlockSpec((1, Cp), lambda i: (0, 0)),
            ],
            out_specs=pl.BlockSpec((B, Lo_pad, Cp), lambda i: (0, 0, 0)),
            scratch_shapes=[pltpu.VMEM((Lpad, Cp), jnp.float32)],
            compiler_params=pltpu.CompilerParams(
                dimension_semantics=("arbitrary",), vmem_limit_bytes=_VMEM_LIMIT),
        )(xq, w_fused, g_p, b_p)
        return out[:, :Lo, :C]

    # ---------------- two-pass path ----------------
    if block_b is None:
        Bt = _choose_block_b(B, L, Cp, Lo_pad)
    else:
        if B % block_b != 0:
            raise ValueError("block_b must divide the batch size")
        Bt = block_b
    nb = B // Bt

    # pass 1: conv + partial BN statistics, fully parallel across grid steps
    psum, psq = pl.pallas_call(
        _stats_kernel,
        out_shape=(jax.ShapeDtypeStruct((nb, 1, Cp), jnp.float32),
                   jax.ShapeDtypeStruct((nb, 1, Cp), jnp.float32)),
        grid=(nb,),
        in_specs=[
            pl.BlockSpec((Bt, L, Cp), lambda i: (i, 0, 0)),
            pl.BlockSpec((3 * Cp, Cp), lambda i: (0, 0)),
        ],
        out_specs=(pl.BlockSpec((1, 1, Cp), lambda i: (i, 0, 0)),
                   pl.BlockSpec((1, 1, Cp), lambda i: (i, 0, 0))),
        compiler_params=pltpu.CompilerParams(
            dimension_semantics=("parallel",), vmem_limit_bytes=_VMEM_LIMIT),
    )(xq, w_fused)

    n = float(B * Lc)
    mu = jnp.sum(psum[:, 0, :], axis=0) / n
    var = jnp.maximum(jnp.sum(psq[:, 0, :], axis=0) / n - mu * mu, 0.0)
    inv = lax.rsqrt(var + 1e-5)
    scale = (g_p[0] * inv).reshape(1, Cp)
    shift = (b_p[0] - mu * g_p[0] * inv).reshape(1, Cp)

    # pass 2: conv recompute + folded BN + ELU + max-pool, parallel over batch tiles
    out = pl.pallas_call(
        _apply_kernel,
        out_shape=jax.ShapeDtypeStruct((B, Lo_pad, Cp), out_dtype),
        grid=(nb,),
        in_specs=[
            pl.BlockSpec((Bt, L, Cp), lambda i: (i, 0, 0)),
            pl.BlockSpec((3 * Cp, Cp), lambda i: (0, 0)),
            pl.BlockSpec((1, Cp), lambda i: (0, 0)),
            pl.BlockSpec((1, Cp), lambda i: (0, 0)),
        ],
        out_specs=pl.BlockSpec((Bt, Lo_pad, Cp), lambda i: (i, 0, 0)),
        scratch_shapes=[pltpu.VMEM((Lpad, Cp), jnp.float32)],
        compiler_params=pltpu.CompilerParams(
            dimension_semantics=("parallel",), vmem_limit_bytes=_VMEM_LIMIT),
    )(xq, w_fused, scale, shift)
    return out[:, :Lo, :C]


# -----------------------------------------------------------------------------------
# Pure-JAX reference with identical semantics (sanity check).
# -----------------------------------------------------------------------------------
def conv_layer_reference(x, conv_w, conv_b, gamma, beta):
    B, L, C = x.shape
    xp = jnp.concatenate([x[:, -2:, :], x, x[:, :2, :]], axis=1)
    Lc = L + 2
    w_t = jnp.transpose(conv_w, (2, 1, 0))
    y = jnp.zeros((B, Lc, C), jnp.float32)
    for k in range(3):
        y = y + jnp.einsum('blc,cd->bld', xp[:, k:k + Lc, :], w_t[k],
                           precision=lax.Precision.HIGHEST)
    y = y + conv_b[None, None, :]
    mu = jnp.mean(y, axis=(0, 1), keepdims=True)
    var = jnp.mean(jnp.square(y - mu), axis=(0, 1), keepdims=True)
    yn = (y - mu) * lax.rsqrt(var + 1e-5) * gamma[None, None, :] + beta[None, None, :]
    ya = jnp.where(yn > 0, yn, jnp.expm1(jnp.minimum(yn, 0.0)))
    Lo = (Lc - 1) // 2 + 1
    cols = []
    for t in range(Lo):
        s = 2 * t - 1
        idxs = [i for i in (s, s + 1, s + 2) if 0 <= i < Lc]
        m = ya[:, idxs[0]:idxs[0] + 1, :]
        for i in idxs[1:]:
            m = jnp.maximum(m, ya[:, i:i + 1, :])
        cols.append(m)
    return jnp.concatenate(cols, axis=1)


if __name__ == "__main__":
    base_key = jax.random.PRNGKey(0)

    fwd = jax.jit(conv_layer_forward,
                  static_argnames=("use_bf16", "force_two_pass", "block_b"))
    ref_fn = jax.jit(conv_layer_reference)

    configs = [
        # (B,  L,   C,  use_bf16, force_two_pass, block_b, atol)
        (2, 16, 8,   False, False, None, 1e-3),   # fused single-call path, Cp=128 im2col conv
        (4, 24, 16,  False, True,  2,    1e-3),   # two-pass pipeline, grid=2, parallel partial stats
        (2, 16, 256, False, False, None, 1e-3),   # C % 128 == 0 fast path + split-tap conv (K=Cp)
        (2, 16, 8,   True,  False, None, 5e-2),   # bf16 MXU operands, f32 accumulation
    ]
    for idx, (B, L, C, use_bf16, two_pass, bb, tol) in enumerate(configs):
        k = jax.random.fold_in(base_key, idx)
        kx, kw, kb, kg, kbe = jax.random.split(k, 5)
        bound = 1.0 / ((C * 3) ** 0.5)
        conv_w = jax.random.uniform(kw, (C, C, 3), minval=-bound, maxval=bound,
                                    dtype=jnp.float32)
        conv_b = jax.random.uniform(kb, (C,), minval=-bound, maxval=bound,
                                    dtype=jnp.float32)
        gamma = jax.random.uniform(kg, (C,), minval=0.5, maxval=1.5, dtype=jnp.float32)
        beta = 0.1 * jax.random.normal(kbe, (C,), dtype=jnp.float32)
        x = jax.random.normal(kx, (B, L, C), dtype=jnp.float32)

        out = jax.block_until_ready(
            fwd(x, conv_w, conv_b, gamma, beta,
                use_bf16=use_bf16, force_two_pass=two_pass, block_b=bb))
        ref = jax.block_until_ready(ref_fn(x, conv_w, conv_b, gamma, beta))

        Lo = (L + 2 - 1) // 2 + 1
        assert out.shape == (B, Lo, C), (out.shape, (B, Lo, C))
        err = float(jnp.max(jnp.abs(out.astype(jnp.float32) - ref)))
        assert err <= tol, (idx, B, L, C, use_bf16, two_pass, err)

    print("KERNEL_OK")
</pallas_src>

<mosaic_0001>
module attributes {stable_mosaic.version = 11 : i64} {
  func.func @_fused_kernel(%arg0: i32, %arg1: memref<2x16x128xf32, #tpu.memory_space<vmem>>, %arg2: memref<384x128xf32, #tpu.memory_space<vmem>>, %arg3: memref<1x128xf32, #tpu.memory_space<vmem>>, %arg4: memref<1x128xf32, #tpu.memory_space<vmem>>, %arg5: memref<2x16x128xf32, #tpu.memory_space<vmem>>, %arg6: memref<40x128xf32, #tpu.memory_space<vmem>>) attributes {dimension_semantics = [#tpu.dimension_semantics<arbitrary>], iteration_bounds = array<i64: 1>, scalar_prefetch = 0 : i64, scratch_operands = 1 : i64, tpu.core_type = #tpu.core_type<tc>, window_params = [{pipeline_mode = #tpu.pipeline_mode<synchronous>, transform_indices = @transform_0, window_bounds = array<i64: 2, 16, 128>}, {pipeline_mode = #tpu.pipeline_mode<synchronous>, transform_indices = @transform_1, window_bounds = array<i64: 384, 128>}, {pipeline_mode = #tpu.pipeline_mode<synchronous>, transform_indices = @transform_2, window_bounds = array<i64: 1, 128>}, {pipeline_mode = #tpu.pipeline_mode<synchronous>, transform_indices = @transform_3, window_bounds = array<i64: 1, 128>}, {pipeline_mode = #tpu.pipeline_mode<synchronous>, transform_indices = @transform_4, window_bounds = array<i64: 2, 16, 128>}]} {
    %c0 = arith.constant 0 : index
    %c0_0 = arith.constant 0 : index
    %c0_1 = arith.constant 0 : index
    %0 = vector.load %arg1[%c0, %c0_0, %c0_1] : memref<2x16x128xf32, #tpu.memory_space<vmem>>, vector<1x16x128xf32>
    %1 = vector.shape_cast %0 : vector<1x16x128xf32> to vector<16x128xf32>
    %2 = vector.extract_strided_slice %1 {offsets = [14, 0], sizes = [2, 128], strides = [1, 1]} : vector<16x128xf32> to vector<2x128xf32>
    %3 = vector.extract_strided_slice %1 {offsets = [0, 0], sizes = [2, 128], strides = [1, 1]} : vector<16x128xf32> to vector<2x128xf32>
    %4 = tpu.concatenate %2, %1, %3 in 0 : vector<2x128xf32>, vector<16x128xf32>, vector<2x128xf32> -> vector<20x128xf32>
    %c1 = arith.constant 1 : index
    %c0_2 = arith.constant 0 : index
    %c0_3 = arith.constant 0 : index
    %5 = vector.load %arg1[%c1, %c0_2, %c0_3] : memref<2x16x128xf32, #tpu.memory_space<vmem>>, vector<1x16x128xf32>
    %6 = vector.shape_cast %5 : vector<1x16x128xf32> to vector<16x128xf32>
    %7 = vector.extract_strided_slice %6 {offsets = [14, 0], sizes = [2, 128], strides = [1, 1]} : vector<16x128xf32> to vector<2x128xf32>
    %8 = vector.extract_strided_slice %6 {offsets = [0, 0], sizes = [2, 128], strides = [1, 1]} : vector<16x128xf32> to vector<2x128xf32>
    %9 = tpu.concatenate %7, %6, %8 in 0 : vector<2x128xf32>, vector<16x128xf32>, vector<2x128xf32> -> vector<20x128xf32>
    %10 = vector.extract_strided_slice %4 {offsets = [0, 0], sizes = [18, 128], strides = [1, 1]} : vector<20x128xf32> to vector<18x128xf32>
    %11 = vector.extract_strided_slice %9 {offsets = [0, 0], sizes = [18, 128], strides = [1, 1]} : vector<20x128xf32> to vector<18x128xf32>
    %12 = tpu.concatenate %10, %11 in 0 : vector<18x128xf32>, vector<18x128xf32> -> vector<36x128xf32>
    %13 = vector.extract_strided_slice %4 {offsets = [1, 0], sizes = [18, 128], strides = [1, 1]} : vector<20x128xf32> to vector<18x128xf32>
    %14 = vector.extract_strided_slice %9 {offsets = [1, 0], sizes = [18, 128], strides = [1, 1]} : vector<20x128xf32> to vector<18x128xf32>
    %15 = tpu.concatenate %13, %14 in 0 : vector<18x128xf32>, vector<18x128xf32> -> vector<36x128xf32>
    %16 = vector.extract_strided_slice %4 {offsets = [2, 0], sizes = [18, 128], strides = [1, 1]} : vector<20x128xf32> to vector<18x128xf32>
    %17 = vector.extract_strided_slice %9 {offsets = [2, 0], sizes = [18, 128], strides = [1, 1]} : vector<20x128xf32> to vector<18x128xf32>
    %18 = tpu.concatenate %16, %17 in 0 : vector<18x128xf32>, vector<18x128xf32> -> vector<36x128xf32>
    %19 = tpu.concatenate %12, %15, %18 in 1 : vector<36x128xf32>, vector<36x128xf32>, vector<36x128xf32> -> vector<36x384xf32>
    %c0_4 = arith.constant 0 : index
    %c0_5 = arith.constant 0 : index
    %20 = vector.load %arg2[%c0_4, %c0_5] : memref<384x128xf32, #tpu.memory_space<vmem>>, vector<384x128xf32>
    %cst = arith.constant dense<0.000000e+00> : vector<36x128xf32>
    %21 = tpu.matmul %19, %20, %cst {dimension_numbers = #tpu.dot_dimension_numbers<[1], [0], [0], [1], [0, 0, 1, 1], [], []>, precision = #tpu.contract_precision<fp32>} : vector<36x384xf32>, vector<384x128xf32>, vector<36x128xf32> -> vector<36x128xf32>
    %cst_6 = arith.constant dense<0.000000e+00> : vector<128xf32>
    %22 = vector.multi_reduction <add>, %21, %cst_6 [0] : vector<36x128xf32> to vector<128xf32>
    %23 = vector.shape_cast %22 : vector<128xf32> to vector<1x128xf32>
    %cst_7 = arith.constant 0.027777778 : f32
    %24 = vector.broadcast %cst_7 : f32 to vector<1x128xf32>
    %25 = arith.mulf %23, %24 : vector<1x128xf32>
    %26 = vector.broadcast %25 : vector<1x128xf32> to vector<36x128xf32>
    %27 = arith.subf %21, %26 : vector<36x128xf32>
    %28 = arith.mulf %27, %27 : vector<36x128xf32>
    %cst_8 = arith.constant dense<0.000000e+00> : vector<128xf32>
    %29 = vector.multi_reduction <add>, %28, %cst_8 [0] : vector<36x128xf32> to vector<128xf32>
    %30 = vector.shape_cast %29 : vector<128xf32> to vector<1x128xf32>
    %cst_9 = arith.constant 0.027777778 : f32
    %31 = vector.broadcast %cst_9 : f32 to vector<1x128xf32>
    %32 = arith.mulf %30, %31 : vector<1x128xf32>
    %c0_10 = arith.constant 0 : index
    %c0_11 = arith.constant 0 : index
    %33 = vector.load %arg3[%c0_10, %c0_11] : memref<1x128xf32, #tpu.memory_space<vmem>>, vector<1x128xf32>
    %cst_12 = arith.constant 9.99999974E-6 : f32
    %34 = vector.broadcast %cst_12 : f32 to vector<1x128xf32>
    %35 = arith.addf %32, %34 : vector<1x128xf32>
    %36 = math.rsqrt %35 : vector<1x128xf32>
    %37 = arith.mulf %33, %36 : vector<1x128xf32>
    %c0_13 = arith.constant 0 : index
    %c0_14 = arith.constant 0 : index
    %38 = vector.load %arg4[%c0_13, %c0_14] : memref<1x128xf32, #tpu.memory_space<vmem>>, vector<1x128xf32>
    %39 = arith.mulf %25, %37 : vector<1x128xf32>
    %40 = arith.subf %38, %39 : vector<1x128xf32>
    %41 = vector.broadcast %37 : vector<1x128xf32> to vector<36x128xf32>
    %42 = arith.mulf %21, %41 : vector<36x128xf32>
    %43 = vector.broadcast %40 : vector<1x128xf32> to vector<36x128xf32>
    %44 = arith.addf %42, %43 : vector<36x128xf32>
    %cst_15 = arith.constant 0.000000e+00 : f32
    %45 = vector.broadcast %cst_15 : f32 to vector<36x128xf32>
    %46 = arith.cmpf ogt, %44, %45 : vector<36x128xf32>
    %cst_16 = arith.constant 0.000000e+00 : f32
    %47 = vector.broadcast %cst_16 : f32 to vector<36x128xf32>
    %48 = arith.minimumf %44, %47 : vector<36x128xf32>
    %49 = math.exp %48 : vector<36x128xf32>
    %cst_17 = arith.constant 1.000000e+00 : f32
    %50 = vector.broadcast %cst_17 : f32 to vector<36x128xf32>
    %51 = arith.subf %49, %50 : vector<36x128xf32>
    %52 = arith.select %46, %44, %51 : vector<36x128xi1>, vector<36x128xf32>
    %cst_18 = arith.constant 0xFF800000 : f32
    %53 = vector.broadcast %cst_18 : f32 to vector<8x128xf32>
    %c0_19 = arith.constant 0 : index
    %c0_20 = arith.constant 0 : index
    %54 = vector.load %arg6[%c0_19, %c0_20] : memref<40x128xf32, #tpu.memory_space<vmem>>, vector<8x128xf32>
    tpu.vector_store %arg6[%c0_19, %c0_20], %53 {strides = array<i32>} : memref<40x128xf32, #tpu.memory_space<vmem>>, vector<8x128xf32>,
    %cst_21 = arith.constant 0xFF800000 : f32
    %55 = vector.broadcast %cst_21 : f32 to vector<14x128xf32>
    %c26 = arith.constant 26 : index
    %c0_22 = arith.constant 0 : index
    %56 = vector.load %arg6[%c26, %c0_22] : memref<40x128xf32, #tpu.memory_space<vmem>>, vector<14x128xf32>
    tpu.vector_store %arg6[%c26, %c0_22], %55 {strides = array<i32>} : memref<40x128xf32, #tpu.memory_space<vmem>>, vector<14x128xf32>,
    %57 = vector.extract_strided_slice %52 {offsets = [0, 0], sizes = [18, 128], strides = [1, 1]} : vector<36x128xf32> to vector<18x128xf32>
    %c8 = arith.constant 8 : index
    %c0_23 = arith.constant 0 : index
    %58 = vector.load %arg6[%c8, %c0_23] : memref<40x128xf32, #tpu.memory_space<vmem>>, vector<18x128xf32>
    tpu.vector_store %arg6[%c8, %c0_23], %57 {strides = array<i32>} : memref<40x128xf32, #tpu.memory_space<vmem>>, vector<18x128xf32>,
    %c7 = arith.constant 7 : index
    %c0_24 = arith.constant 0 : index
    %59 = tpu.strided_load %arg6[%c7, %c0_24] {strides = array<i32: 2, 1>} : memref<40x128xf32, #tpu.memory_space<vmem>>, vector<16x128xf32>
    %c8_25 = arith.constant 8 : index
    %c0_26 = arith.constant 0 : index
    %60 = tpu.strided_load %arg6[%c8_25, %c0_26] {strides = array<i32: 2, 1>} : memref<40x128xf32, #tpu.memory_space<vmem>>, vector<16x128xf32>
    %c9 = arith.constant 9 : index
    %c0_27 = arith.constant 0 : index
    %61 = tpu.strided_load %arg6[%c9, %c0_27] {strides = array<i32: 2, 1>} : memref<40x128xf32, #tpu.memory_space<vmem>>, vector<16x128xf32>
    %62 = arith.maximumf %59, %60 : vector<16x128xf32>
    %63 = arith.maximumf %62, %61 : vector<16x128xf32>
    %c0_28 = arith.constant 0 : index
    %c0_29 = arith.constant 0 : index
    %c0_30 = arith.constant 0 : index
    %64 = vector.load %arg5[%c0_28, %c0_29, %c0_30] : memref<2x16x128xf32, #tpu.memory_space<vmem>>, vector<1x16x128xf32>
    %65 = vector.shape_cast %64 : vector<1x16x128xf32> to vector<16x128xf32>
    %66 = vector.shape_cast %63 : vector<16x128xf32> to vector<1x16x128xf32>
    tpu.vector_store %arg5[%c0_28, %c0_29, %c0_30], %66 {strides = array<i32>} : memref<2x16x128xf32, #tpu.memory_space<vmem>>, vector<1x16x128xf32>,
    %67 = vector.extract_strided_slice %52 {offsets = [18, 0], sizes = [18, 128], strides = [1, 1]} : vector<36x128xf32> to vector<18x128xf32>
    %c8_31 = arith.constant 8 : index
    %c0_32 = arith.constant 0 : index
    %68 = vector.load %arg6[%c8_31, %c0_32] : memref<40x128xf32, #tpu.memory_space<vmem>>, vector<18x128xf32>
    tpu.vector_store %arg6[%c8_31, %c0_32], %67 {strides = array<i32>} : memref<40x128xf32, #tpu.memory_space<vmem>>, vector<18x128xf32>,
    %c7_33 = arith.constant 7 : index
    %c0_34 = arith.constant 0 : index
    %69 = tpu.strided_load %arg6[%c7_33, %c0_34] {strides = array<i32: 2, 1>} : memref<40x128xf32, #tpu.memory_space<vmem>>, vector<16x128xf32>
    %c8_35 = arith.constant 8 : index
    %c0_36 = arith.constant 0 : index
    %70 = tpu.strided_load %arg6[%c8_35, %c0_36] {strides = array<i32: 2, 1>} : memref<40x128xf32, #tpu.memory_space<vmem>>, vector<16x128xf32>
    %c9_37 = arith.constant 9 : index
    %c0_38 = arith.constant 0 : index
    %71 = tpu.strided_load %arg6[%c9_37, %c0_38] {strides = array<i32: 2, 1>} : memref<40x128xf32, #tpu.memory_space<vmem>>, vector<16x128xf32>
    %72 = arith.maximumf %69, %70 : vector<16x128xf32>
    %73 = arith.maximumf %72, %71 : vector<16x128xf32>
    %c1_39 = arith.constant 1 : index
    %c0_40 = arith.constant 0 : index
    %c0_41 = arith.constant 0 : index
    %74 = vector.load %arg5[%c1_39, %c0_40, %c0_41] : memref<2x16x128xf32, #tpu.memory_space<vmem>>, vector<1x16x128xf32>
    %75 = vector.shape_cast %74 : vector<1x16x128xf32> to vector<16x128xf32>
    %76 = vector.shape_cast %73 : vector<16x128xf32> to vector<1x16x128xf32>
    tpu.vector_store %arg5[%c1_39, %c0_40, %c0_41], %76 {strides = array<i32>} : memref<2x16x128xf32, #tpu.memory_space<vmem>>, vector<1x16x128xf32>,
    return
  }
  func.func @transform_0(%arg0: i32) -> (i32, i32, i32) {
    %c0_i32 = arith.constant 0 : i32
    %c0_i32_0 = arith.constant 0 : i32
    %c0_i32_1 = arith.constant 0 : i32
    %c0_i32_2 = arith.constant 0 : i32
    return %c0_i32, %c0_i32_0, %c0_i32_1 : i32, i32, i32
  }
  func.func @transform_1(%arg0: i32) -> (i32, i32) {
    %c0_i32 = arith.constant 0 : i32
    %c0_i32_0 = arith.constant 0 : i32
    %c0_i32_1 = arith.constant 0 : i32
    return %c0_i32, %c0_i32_0 : i32, i32
  }
  func.func @transform_2(%arg0: i32) -> (i32, i32) {
    %c0_i32 = arith.constant 0 : i32
    %c0_i32_0 = arith.constant 0 : i32
    %c0_i32_1 = arith.constant 0 : i32
    return %c0_i32, %c0_i32_0 : i32, i32
  }
  func.func @transform_3(%arg0: i32) -> (i32, i32) {
    %c0_i32 = arith.constant 0 : i32
    %c0_i32_0 = arith.constant 0 : i32
    %c0_i32_1 = arith.constant 0 : i32
    return %c0_i32, %c0_i32_0 : i32, i32
  }
  func.func @transform_4(%arg0: i32) -> (i32, i32, i32) {
    %c0_i32 = arith.constant 0 : i32
    %c0_i32_0 = arith.constant 0 : i32
    %c0_i32_1 = arith.constant 0 : i32
    %c0_i32_2 = arith.constant 0 : i32
    return %c0_i32, %c0_i32_0, %c0_i32_1 : i32, i32, i32
  }
}

</mosaic_0001>

<bundles_post_ra>
// kernel: conv_layer_forward.1
= control target key start
LH: loop header
LB: loop body
LE: loop exit
PB: predicated region body
PF: predicated region fallthrough
CT: control target
= control target key end

     0   :  { %vm23_vm0 = vcmask 1041408   ;;  %vm51_vm1 = vcmask 1046528   ;;  %vm59_vm2 = vcmask 1040384   ;;  %vm68_vm3 = vcmask 1045504   ;;  %s4337_s1 = inlined_call_operand.vmem [shape: f32[384,128], index: 1, kind: input, shape index: {}]   ;;  %s4338_s0 = inlined_call_operand.vmem [shape: f32[2,16,128], index: 0, kind: input, shape index: {}]   ;;  %s4339_s2 = inlined_call_operand.vmem [shape: f32[1,128], index: 2, kind: input, shape index: {}]   ;;  %s4340_s3 = inlined_call_operand.vmem [shape: f32[1,128], index: 3, kind: input, shape index: {}]   ;;  %s4341_s4 = inlined_call_operand.vmem [shape: f32[2,16,128], index: 4, kind: output, shape index: {}]  }
   0x1   :  { %v108_v0 = vld [vmem:[%s4337_s1 + $0xf8] sm:$0xff]  ;;  %v107_v2 = vld [vmem:[%s4337_s1 + $0xf0] sm:$0xff]  ;;  %v106_v7 = vld [vmem:[%s4337_s1 + $0xe8] sm:$0xff]  ;;  %vm2877_vm4 = vmmov 0   ;;  %vm2027_vm5 = vcmask 1043456  }
   0x2   :  { %v92_v1 = vld [vmem:[%s4337_s1 + $0x78] sm:$0xff]  ;;  %v2913_v3 = vand.u32 4294901760, %v108_v0  ;;  %v2917_v5 = vand.u32 4294901760, %v107_v2  ;;  %v91_v6 = vld [vmem:[%s4337_s1 + $0x70] sm:$0xff]  ;;  %v90_v8 = vld [vmem:[%s4337_s1 + $0x68] sm:$0xff]  ;;  %v2930_v10 = vand.u32 4294901760, %v106_v7 }
   0x3   :  { %v2915_v4 = vand.u32 4294901760, %v92_v1  ;;  %v2928_v9 = vand.u32 4294901760, %v91_v6  ;;  %v2932_v11 = vand.u32 4294901760, %v90_v8  ;;  %v105_v12 = vld [vmem:[%s4337_s1 + $0xe0] sm:$0xff]  ;;  %v104_v14 = vld [vmem:[%s4337_s1 + $0xd8] sm:$0xff]  ;;  %v2961_v20 = vld [vmem:[%s4337_s1 + $0xd0] sm:$0xff] }
   0x4   :  { %4464 = vst [vmem:[#allocation3_spill] sm:$0xff] %v2913_v3  ;;  %4466 = vst [vmem:[#allocation5_spill] sm:$0xff] %v2917_v5  ;;  %v89_v13 = vld [vmem:[%s4337_s1 + $0x60] sm:$0xff]  ;;  %2171 = vmatprep.subr.mxu0 %v2913_v3  ;;  %v2944_v15 = vand.u32 4294901760, %v105_v12  ;;  %v2948_v17 = vand.u32 4294901760, %v104_v14  ;;  %v2951_v18 = vsub.f32 %v108_v0, %v2913_v3  ;;  %v2956_v19 = vld [vmem:[%s4337_s1 + $0x58] sm:$0xff]  ;;  %v2979_v25 = vsub.f32 %v107_v2, %v2917_v5 }
   0x5   :  { %4465 = vst [vmem:[#allocation4_spill] sm:$0xff] %v2915_v4  ;;  %4467 = vst [vmem:[#allocation6_spill] sm:$0xff] %v2928_v9  ;;  %v2946_v16 = vand.u32 4294901760, %v89_v13  ;;  %v2966_v21 = vld [vmem:[%s4337_s1 + $0x50] sm:$0xff]  ;;  %2172 = vmatpush3.msra.mxu0 %v2915_v4  ;;  %v2970_v22 = vand.u32 4294901760, %v2956_v19  ;;  %v2973_v23 = vsub.f32 %v92_v1, %v2915_v4  ;;  %v2976_v24 = vand.u32 4294901760, %v2961_v20 }
   0x6   :  { %4468 = vst [vmem:[#allocation7_spill] sm:$0xff] %v2948_v17  ;;  %4469 = vst [vmem:[#allocation8_spill] sm:$0xff] %v2951_v18  ;;  %v2984_v26 = vld [vmem:[%s4337_s1 + $0xc8] sm:$0xff]  ;;  %v2994_v28 = vld [vmem:[%s4337_s1 + $0xc0] sm:$0xff]  ;;  %2173 = vmatprep.subr.mxu0 %v2917_v5  ;;  %v4355_v29 = vand.u32 4294901760, %v2951_v18  ;;  %v2999_v30 = vand.u32 4294901760, %v2966_v21  ;;  %v3002_v31 = vsub.f32 %v91_v6, %v2928_v9  ;;  %v3011_v35 = vsub.f32 %v106_v7, %v2930_v10 }
   0x7   :  { %4470 = vst [vmem:[#allocation9_spill] sm:$0xff] %v2970_v22  ;;  %4471 = vst [vmem:[#allocation10_spill] sm:$0xff] %v2976_v24  ;;  %v2989_v27 = vld [vmem:[%s4337_s1 + $0x48] sm:$0xff]  ;;  %v3005_v32 = vand.u32 4294901760, %v2984_v26  ;;  %2174 = vmatpush3.msra.mxu0 %v2928_v9  ;;  %v4354_v33 = vand.u32 4294901760, %v2973_v23  ;;  %v4352_v34 = vand.u32 4294901760, %v2979_v25  ;;  %v3027_v40 = vsub.f32 %v90_v8, %v2932_v11 }
   0x8   :  { %4472 = vst [vmem:[#allocation11_spill] sm:$0xff] %v2999_v30  ;;  %v3014_v36 = vand.u32 4294901760, %v2989_v27  ;;  %v3019_v37 = vld [vmem:[%s4337_s1 + $0x40] sm:$0xff]  ;;  %2175 = vmatprep.subr.mxu0 %v2930_v10  ;;  %v413_v38 = vsub.f32 %v2951_v18, %v4355_v29  ;;  %v4351_v39 = vand.u32 4294901760, %v3002_v31  ;;  %v3030_v41 = vand.u32 4294901760, %v2994_v28  ;;  %v3046_v46 = vld [vmem:[%s4337_s1 + $0xb8] sm:$0xff] }
   0x9   :  { %4473 = vst [vmem:[#allocation12_spill] sm:$0xff] %v3005_v32  ;;  %2176 = vmatpush3.msra.mxu0 %v2932_v11  ;;  %v301_v42 = vsub.f32 %v2973_v23, %v4354_v33  ;;  %v420_v43 = vsub.f32 %v2979_v25, %v4352_v34  ;;  %v4349_v44 = vand.u32 4294901760, %v3011_v35  ;;  %v3041_v45 = vsub.f32 %v105_v12, %v2944_v15  ;;  %v3059_v51 = vld [vmem:[%s4337_s1 + $0x38] sm:$0xff]  ;;  %v3069_v56 = vld [vmem:[%s4337_s1 + $0xb0] sm:$0xff]  ;;  %v3099_v2 = vld [vmem:[%s4337_s1 + $0xa8] sm:$0xff] }
   0xa   :  { %4474 = vst [vmem:[#allocation13_spill] sm:$0xff] %v3014_v36  ;;  %4475 = vst [vmem:[#allocation14_spill] sm:$0xff] %v3030_v41  ;;  %2177 = vmatprep.subr.mxu0 %v2944_v15  ;;  %v414_v47 = vand.u32 4294901760, %v413_v38  ;;  %v308_v48 = vsub.f32 %v3002_v31, %v4351_v39  ;;  %v4347_v49 = vand.u32 4294901760, %v3027_v40  ;;  %v3054_v50 = vand.u32 4294901760, %v3019_v37  ;;  %v3084_v61 = vld [vmem:[%s4337_s1 + $0x30] sm:$0xff] }
   0xb   :  { %2178 = vmatpush3.msra.mxu0 %v2946_v16  ;;  %v302_v52 = vand.u32 4294901760, %v301_v42  ;;  %v421_v53 = vand.u32 4294901760, %v420_v43  ;;  %v427_v54 = vsub.f32 %v3011_v35, %v4349_v44  ;;  %v4346_v55 = vand.u32 4294901760, %v3041_v45  ;;  %v3208_v44 = vld [vmem:[%s4337_s1 + $0x90] sm:$0xff]  ;;  %v3235_v33 = vld [vmem:[%s4337_s1 + $0x88] sm:$0xff] }
   0xc   :  { %4476 = vst [vmem:[#allocation15_spill] sm:$0xff] %v3054_v50  ;;  %2179 = vmatprep.subr.mxu0 %v2948_v17  ;;  %2218 = vmatprep.subr.mxu1 %v414_v47  ;;  %v309_v57 = vand.u32 4294901760, %v308_v48  ;;  %v315_v58 = vsub.f32 %v3027_v40, %v4347_v49  ;;  %v3076_v59 = vsub.f32 %v89_v13, %v2946_v16  ;;  %v3079_v60 = vand.u32 4294901760, %v3046_v46  ;;  %v3113_v13 = vld [vmem:[%s4337_s1 + $0x28] sm:$0xff]  ;;  %v3192_v49 = vld [vmem:[%s4337_s1 + $0x18] sm:$0xff] }
   0xd   :  { %2180 = vmatpush3.msra.mxu0 %v2970_v22  ;;  %2219 = vmatpush3.msra.mxu1 %v302_v52  ;;  %v428_v62 = vand.u32 4294901760, %v427_v54  ;;  %v434_v63 = vsub.f32 %v3041_v45, %v4346_v55  ;;  %v3091_v0 = vsub.f32 %v104_v14, %v2948_v17  ;;  %v3094_v1 = vand.u32 4294901760, %v3059_v51 }
   0xe   :  { %4477 = vst [vmem:[#allocation16_spill] sm:$0xff] %v3079_v60  ;;  %2181 = vmatprep.subr.mxu0 %v2976_v24  ;;  %2220 = vmatprep.subr.mxu1 %v421_v53  ;;  %v316_v6 = vand.u32 4294901760, %v315_v58  ;;  %v4344_v7 = vand.u32 4294901760, %v3076_v59  ;;  %v3105_v8 = vsub.f32 %v2956_v19, %v2970_v22  ;;  %v3108_v12 = vand.u32 4294901760, %v3069_v56 }
   0xf   :  { %4478 = vst [vmem:[#allocation17_spill] sm:$0xff] %v3094_v1  ;;  %2182 = vmatpush3.msra.mxu0 %v2999_v30  ;;  %2221 = vmatpush3.msra.mxu1 %v309_v57  ;;  %v435_v14 = vand.u32 4294901760, %v434_v63  ;;  %v4342_v38 = vand.u32 4294901760, %v3091_v0  ;;  %v3119_v42 = vsub.f32 %v2961_v20, %v2976_v24  ;;  %v3122_v19 = vand.u32 4294901760, %v3084_v61  ;;  %v3139_v20 = vld [vmem:[%s4337_s1 + $0xa0] sm:$0xff] }
  0x10   :  { %4479 = vst [vmem:[#allocation18_spill] sm:$0xff] %v3108_v12  ;;  %2183 = vmatprep.subr.mxu0 %v3005_v32  ;;  %2222 = vmatprep.subr.mxu1 %v428_v62  ;;  %v322_v43 = vsub.f32 %v3076_v59, %v4344_v7  ;;  %v4343_v47 = vand.u32 4294901760, %v3105_v8  ;;  %v3131_v48 = vsub.f32 %v2966_v21, %v2999_v30  ;;  %v3134_v52 = vand.u32 4294901760, %v3099_v2 }
  0x11   :  { %4480 = vst [vmem:[#allocation19_spill] sm:$0xff] %v3122_v19  ;;  %2184 = vmatpush3.msra.mxu0 %v3014_v36  ;;  %2223 = vmatpush3.msra.mxu1 %v316_v6  ;;  %v441_v53 = vsub.f32 %v3091_v0, %v4342_v38  ;;  %v4345_v54 = vand.u32 4294901760, %v3119_v42  ;;  %v3148_v21 = vsub.f32 %v2984_v26, %v3005_v32  ;;  %v3151_v57 = vand.u32 4294901760, %v3113_v13  ;;  %v3165_v26 = vld [vmem:[%s4337_s1 + $0x20] sm:$0xff] }
  0x12   :  { %4481 = vst [vmem:[#allocation20_spill] sm:$0xff] %v3134_v52  ;;  %2185 = vmatprep.subr.mxu0 %v3030_v41  ;;  %2224 = vmatprep.subr.mxu1 %v435_v14  ;;  %v323_v58 = vand.u32 4294901760, %v322_v43  ;;  %v329_v62 = vsub.f32 %v3105_v8, %v4343_v47  ;;  %v4348_v63 = vand.u32 4294901760, %v3131_v48  ;;  %v3160_v6 = vsub.f32 %v2989_v27, %v3014_v36  ;;  %v3178_v27 = vld [vmem:[%s4337_s1 + $0x98] sm:$0xff] }
  0x13   :  { %4482 = vst [vmem:[#allocation21_spill] sm:$0xff] %v3151_v57  ;;  %2186 = vmatpush3.msra.mxu0 %v3054_v50  ;;  %v442_v38 = vand.u32 4294901760, %v441_v53  ;;  %v448_v14 = vsub.f32 %v3119_v42, %v4345_v54  ;;  %v4350_v43 = vand.u32 4294901760, %v3148_v21  ;;  %v3173_v47 = vand.u32 4294901760, %v3139_v20 }
  0x14   :  { %2225 = vmatpush3.msra.mxu1 %v323_v58  ;;  %2187 = vmatprep.subr.mxu0 %v3079_v60  ;;  %v330_v7 = vand.u32 4294901760, %v329_v62  ;;  %v336_v53 = vsub.f32 %v3131_v48, %v4348_v63  ;;  %v4353_v54 = vand.u32 4294901760, %v3160_v6  ;;  %v3187_v55 = vsub.f32 %v2994_v28, %v3030_v41 }
  0x15   :  { %4483 = vst [vmem:[#allocation22_spill] sm:$0xff] %v3173_v47  ;;  %2226 = vmatprep.subr.mxu1 %v442_v38  ;;  %2188 = vmatpush3.msra.mxu0 %v3094_v1  ;;  %v449_v58 = vand.u32 4294901760, %v448_v14  ;;  %v455_v62 = vsub.f32 %v3148_v21, %v4350_v43  ;;  %v3199_v63 = vand.u32 4294901760, %v3165_v26  ;;  %v3203_v28 = vsub.f32 %v3019_v37, %v3054_v50  ;;  %v3221_v37 = vld [vmem:[%s4337_s1 + $0x10] sm:$0xff] }
  0x16   :  { %2227 = vmatpush3.msra.mxu1 %v330_v7  ;;  %2189 = vmatprep.subr.mxu0 %v3108_v12  ;;  %v337_v38 = vand.u32 4294901760, %v336_v53  ;;  %v343_v14 = vsub.f32 %v3160_v6, %v4353_v54  ;;  %v4356_v43 = vand.u32 4294901760, %v3187_v55  ;;  %v3216_v39 = vand.u32 4294901760, %v3178_v27 }
  0x17   :  { %2228 = vmatprep.subr.mxu1 %v449_v58  ;;  %2190 = vmatpush3.msra.mxu0 %v3122_v19  ;;  %v456_v7 = vand.u32 4294901760, %v455_v62  ;;  %v4359_v53 = vand.u32 4294901760, %v3203_v28  ;;  %v3227_v34 = vsub.f32 %v3046_v46, %v3079_v60  ;;  %v3230_v54 = vand.u32 4294901760, %v3192_v49 }
  0x18   :  { %4484 = vst [vmem:[#allocation23_spill] sm:$0xff] %v3216_v39  ;;  %2229 = vmatpush3.msra.mxu1 %v337_v38  ;;  %2191 = vmatprep.subr.mxu0 %v3134_v52  ;;  %v344_v58 = vand.u32 4294901760, %v343_v14  ;;  %v462_v62 = vsub.f32 %v3187_v55, %v4356_v43  ;;  %v3243_v46 = vsub.f32 %v3059_v51, %v3094_v1  ;;  %v3246_v29 = vand.u32 4294901760, %v3208_v44  ;;  %v3263_v1 = vld [vmem:[%s4337_s1 + $0x8] sm:$0xff] }
  0x19   :  { %4485 = vst [vmem:[#allocation24_spill] sm:$0xff] %v3230_v54  ;;  %2230 = vmatprep.subr.mxu1 %v456_v7  ;;  %2192 = vmatpush3.msra.mxu0 %v3151_v57  ;;  %v350_v38 = vsub.f32 %v3203_v28, %v4359_v53  ;;  %v3255_v43 = vsub.f32 %v3069_v56, %v3108_v12  ;;  %v3258_v51 = vand.u32 4294901760, %v3221_v37  ;;  %v3272_v56 = vand.u32 4294901760, %v3235_v33  ;;  %v3277_v12 = vld [vmem:[%s4337_s1 + $0x80] sm:$0xff] }
  0x1a   :  { %4486 = vst [vmem:[#allocation25_spill] sm:$0xff] %v3243_v46  ;;  %4487 = vst [vmem:[#allocation26_spill] sm:$0xff] %v3246_v29  ;;  %2231 = vmatpush3.msra.mxu1 %v344_v58  ;;  %2193 = vmatprep.subr.mxu0 %v3173_v47  ;;  %v463_v7 = vand.u32 4294901760, %v462_v62  ;;  %v3269_v14 = vsub.f32 %v3084_v61, %v3122_v19  ;;  %v4492_v60 = vand.u32 4294901760, %v3227_v34  ;;  %v4494_v19 = vand.u32 4294901760, %v3243_v46 }
  0x1b   :  { %4488 = vst [vmem:[#allocation27_spill] sm:$0xff] %v3255_v43  ;;  %4489 = vst [vmem:[#allocation28_spill] sm:$0xff] %v3258_v51  ;;  %2194 = vmatpush3.msra.mxu0 %v3199_v63  ;;  %v351_v58 = vand.u32 4294901760, %v350_v38  ;;  %v4376_v53 = vand.u32 4294901760, %v3255_v43  ;;  %v3286_v61 = vsub.f32 %v3099_v2, %v3134_v52  ;;  %v3294_v41 = vand.u32 4294901760, %v3263_v1  ;;  %v3303_v2 = vld [vmem:[%s4337_s1] sm:$0xff] }
  0x1c   :  { %4490 = vst [vmem:[#allocation29_spill] sm:$0xff] %v3269_v14  ;;  %4491 = vst [vmem:[#allocation30_spill] sm:$0xff] %v3272_v56  ;;  %v469_v62 = vsub.f32 %v3227_v34, %v4492_v60  ;;  %2232 = vmatprep.subr.mxu1 %v463_v7  ;;  %2195 = vmatprep.subr.mxu0 %v3216_v39  ;;  %v357_v50 = vsub.f32 %v3243_v46, %v4494_v19  ;;  %v3311_v52 = vand.u32 4294901760, %v3277_v12  ;;  %v17_v38 = vld [vmem:[%s4338_s0] sm:$0xff] }
  0x1d   :  { %4493 = vst [vmem:[#allocation31_spill] sm:$0xff] %v3286_v61  ;;  %4495 = vst [vmem:[#allocation32_spill] sm:$0xff] %v3294_v41  ;;  %v3298_v60 = vsub.f32 %v3113_v13, %v3151_v57  ;;  %2233 = vmatpush3.msra.mxu1 %v351_v58  ;;  %2196 = vmatpush3.msra.mxu0 %v3230_v54  ;;  %v476_v19 = vsub.f32 %v3255_v43, %v4376_v53  ;;  %v18_v13 = vld [vmem:[%s4338_s0 + $0x8] sm:$0xff]  ;;  %v4497_v58 = vand.u32 4294901760, %v3269_v14 }
  0x1e   :  { %v470_v7 = vand.u32 4294901760, %v469_v62  ;;  %4496 = vst [vmem:[#allocation33_spill] sm:$0xff] %v3311_v52  ;;  %v358_v57 = vand.u32 4294901760, %v357_v50  ;;  %2197 = vmatprep.subr.mxu0 %v3246_v29  ;;  %v3323_v53 = vsub.f32 %v3139_v20, %v3173_v47  ;;  %v4499_v50 = vand.u32 4294901760, %v3286_v61 }
  0x1f   :  { %v364_v62 = vsub.f32 %v3269_v14, %v4497_v58  ;;  %v477_v32 = vand.u32 4294901760, %v476_v19  ;;  %2198 = vmatpush3.msra.mxu0 %v3258_v51  ;;  %v3333_v58 = vand.u32 4294901760, %v3303_v2  ;;  %v3337_v36 = vsub.f32 %v3165_v26, %v3199_v63 }
  0x20   :  { %4498 = vst [vmem:[#allocation34_spill] sm:$0xff] %v3323_v53  ;;  %2234 = vmatprep.subr.mxu1 %v470_v7  ;;  %v483_v43 = vsub.f32 %v3286_v61, %v4499_v50  ;;  %2199 = vmatprep.subr.mxu0 %v3272_v56  ;;  %v4502_v7 = vand.u32 4294901760, %v3298_v60  ;;  %v4391_v47 = vand.u32 4294901760, %v3323_v53  ;;  %v20_v14 = vrot.slane %v18_v13, 6 }
  0x21   :  { %4500 = vst [vmem:[#allocation35_spill] sm:$0xff] %v3333_v58  ;;  %4501 = vst [vmem:[#allocation36_spill] sm:$0xff] %v3337_v36  ;;  %2235 = vmatpush3.msra.mxu1 %v358_v57  ;;  %v365_v20 = vand.u32 4294901760, %v364_v62  ;;  %2200 = vmatpush3.msra.mxu0 %v3294_v41  ;;  %v4389_v61 = vand.u32 4294901760, %v3337_v36  ;;  %v24_v30 = vrot.slane %v17_v38, 6  ;;  %v3348_v57 = vsub.f32 %v3178_v27, %v3216_v39 }
  0x22   :  { %v371_v19 = vsub.f32 %v3298_v60, %v4502_v7  ;;  %2236 = vmatprep.subr.mxu1 %v477_v32  ;;  %v484_v50 = vand.u32 4294901760, %v483_v43  ;;  %2201 = vmatprep.subr.mxu0 %v3311_v52  ;;  %v490_v62 = vsub.f32 %v3323_v53, %v4391_v47  ;;  %v3356_v32 = vsub.f32 %v3192_v49, %v3230_v54 }
  0x23   :  { %2237 = vmatpush3.msra.mxu1 %v365_v20  ;;  %v3360_v43 = vsub.f32 %v3208_v44, %v3246_v29  ;;  %2202 = vmatpush3.msra.mxu0 %v3333_v58  ;;  %v378_v27 = vsub.f32 %v3337_v36, %v4389_v61  ;;  %v3367_v38 = vsel %vm23_vm0, %v24_v30, %v20_v14  ;;  %v4390_v49 = vand.u32 4294901760, %v3348_v57 }
  0x24   :  { %v372_v26 = vand.u32 4294901760, %v371_v19  ;;  %2238 = vmatprep.subr.mxu1 %v484_v50  ;;  %v3370_v13 = vsel %vm23_vm0, %v20_v14, %v24_v30  ;;  %v491_v20 = vand.u32 4294901760, %v490_v62  ;;  %v53_v7 = vrot.slane %v3367_v38, 1  ;;  %2265 = vmatprep.subr.mxu0 %v2951_v18 }
  0x25   :  { %v3374_v44 = vrot.slane %v3370_v13, 1  ;;  %v379_v19 = vand.u32 4294901760, %v378_v27  ;;  %v497_v50 = vsub.f32 %v3348_v57, %v4390_v49  ;;  %v3382_v61 = vand.u32 4294901760, %v3370_v13 }
  0x26   :  { %2239 = vmatpush3.msra.mxu1 %v372_v26  ;;  %v4400_v30 = vand.u32 4294901760, %v3356_v32  ;;  %v3390_v62 = vsub.f32 %v3221_v37, %v3258_v51  ;;  %v3394_v27 = vsub.f32 %v3235_v33, %v3272_v56  ;;  %v4506_v29 = vand.u32 4294901760, %v3360_v43 }
  0x27   :  { %4503 = vst [vmem:[#allocation37_spill] sm:$0xff] %v3382_v61  ;;  %2240 = vmatprep.subr.mxu1 %v491_v20  ;;  %v54_v14 = vsel %vm51_vm1, %v3374_v44, %v53_v7  ;;  %v498_v47 = vand.u32 4294901760, %v497_v50  ;;  %v3400_v20 = vsub.f32 %v3370_v13, %v3382_v61 }
  0x28   :  { %2241 = vmatpush3.msra.mxu1 %v379_v19  ;;  %v3396_v49 = vand.u32 4294901760, %v54_v14  ;;  %v385_v26 = vsub.f32 %v3356_v32, %v4400_v30  ;;  %v504_v37 = vsub.f32 %v3360_v43, %v4506_v29  ;;  %v4403_v51 = vand.u32 4294901760, %v3390_v62 }
  0x29   :  { %4505 = vst [vmem:[#allocation39_spill] sm:$0xff] %v3400_v20  ;;  %v3412_v19 = vsub.f32 %v3263_v1, %v3294_v41  ;;  %2242 = vmatprep.subr.mxu1 %v498_v47  ;;  %v3420_v30 = vsub.f32 %v3277_v12, %v3311_v52  ;;  %v4507_v1 = vand.u32 4294901760, %v3394_v27 }
  0x2a   :  { %4504 = vst [vmem:[#allocation38_spill] sm:$0xff] %v3396_v49  ;;  %v3415_v50 = vsub.f32 %v54_v14, %v3396_v49  ;;  %v386_v54 = vand.u32 4294901760, %v385_v26  ;;  %522 = vmatprep.mubr.f32.mxu1 %v3396_v49  ;;  %v505_v29 = vand.u32 4294901760, %v504_v37  ;;  %v392_v33 = vsub.f32 %v3390_v62, %v4403_v51  ;;  %v2163_v51 = vld [vmem:[%s4338_s0 + $0x18] sm:$0xff] }
  0x2b   :  { %v511_v14 = vsub.f32 %v3394_v27, %v4507_v1  ;;  %v4508_v26 = vand.u32 4294901760, %v3400_v20  ;;  %v3437_v37 = vsub.f32 %v3303_v2, %v3333_v58  ;;  %v4509_v56 = vand.u32 4294901760, %v3412_v19 }
  0x2c   :  { %2243 = vmatpush3.msra.mxu1 %v386_v54  ;;  %v393_v1 = vand.u32 4294901760, %v392_v33  ;;  %v55_v54 = vsel %vm51_vm1, %v53_v7, %v3374_v44  ;;  %v4510_v2 = vand.u32 4294901760, %v3415_v50  ;;  %v3460_v7 = vand.u32 4294901760, %v3367_v38 }
  0x2d   :  { %v230_v12 = vsub.f32 %v3400_v20, %v4508_v26  ;;  %2244 = vmatprep.subr.mxu1 %v505_v29  ;;  %v512_v47 = vand.u32 4294901760, %v511_v14  ;;  %v399_v52 = vsub.f32 %v3412_v19, %v4509_v56  ;;  %v2162_v26 = vld [vmem:[%s4338_s0 + $0x10] sm:$0xff]  ;;  %v4511_v29 = vand.u32 4294901760, %v3420_v30 }
  0x2e   :  { %v224_v49 = vsub.f32 %v3415_v50, %v4510_v2  ;;  %v4415_v14 = vand.u32 4294901760, %v3437_v37  ;;  %2245 = vmatpush3.msra.mxu1 %v393_v1  ;;  %v3457_v41 = vand.u32 4294901760, %v55_v54  ;;  %4513 = vst [vmem:[#allocation41_spill] sm:$0xff] %v3460_v7  ;;  %v33_v18 = vrot.slane %v2163_v51, 6 }
  0x2f   :  { %v231_v58 = vand.u32 4294901760, %v230_v12  ;;  %v518_v33 = vsub.f32 %v3420_v30, %v4511_v29  ;;  %v400_v56 = vand.u32 4294901760, %v399_v52  ;;  %2246 = vmatprep.subr.mxu1 %v512_v47  ;;  %v36_v2 = vrot.slane %v2162_v26, 6 }
  0x30   :  { %4512 = vst [vmem:[#allocation40_spill] sm:$0xff] %v3457_v41  ;;  %v225_v39 = vand.u32 4294901760, %v224_v49  ;;  %v406_v12 = vsub.f32 %v3437_v37, %v4415_v14  ;;  %v3466_v29 = vsub.f32 %v55_v54, %v3457_v41  ;;  %v3470_v52 = vsub.f32 %v3367_v38, %v3460_v7 }
  0x31   :  { %v519_v20 = vand.u32 4294901760, %v518_v33  ;;  %2247 = vmatpush3.msra.mxu1 %v400_v56  ;;  %v3473_v51 = vsel %vm23_vm0, %v33_v18, %v36_v2  ;;  %v3476_v49 = vsel %vm23_vm0, %v36_v2, %v33_v18 }
  0x32   :  { %226 = vmatprep.mubr.f32.mxu0 %v225_v39  ;;  %v407_v1 = vand.u32 4294901760, %v406_v12  ;;  %4514 = vst [vmem:[#allocation42_spill] sm:$0xff] %v3473_v51  ;;  %4515 = vst [vmem:[#allocation43_spill] sm:$0xff] %v3476_v49  ;;  %v4416_v47 = vand.u32 4294901760, %v3466_v29  ;;  %v4422_v54 = vand.u32 4294901760, %v3470_v52  ;;  %v60_v26 = vrot.slane %v3473_v51, 7 }
  0x33   :  { %2248 = vmatprep.subr.mxu1 %v519_v20  ;;  %232 = vmatmul.mubr.f32.vlgmr.msra.gmra.mxu0 %v231_v58  ;;  %v42_v33 = vrot.slane %v3473_v51, 6  ;;  %v61_v39 = vrot.slane %v3476_v49, 7  ;;  %v43_v20 = vrot.slane %v3476_v49, 6 }
  0x34   :  { %2266 = vmatpush3.msra.mxu0 %v2973_v23  ;;  %2249 = vmatpush3.msra.mxu1 %v407_v1  ;;  %v239_v18 = vsub.f32 %v3466_v29, %v4416_v47  ;;  %v67_v58 = vsel %vm23_vm0, %v3374_v44, %v60_v26  ;;  %v245_v44 = vsub.f32 %v3470_v52, %v4422_v54 }
  0x35   :  { %2267 = vmatprep.subr.mxu0 %v2979_v25  ;;  %524 = vmatmul.mubr.f32.vlgmr.msra.gmra.mxu1 %v3382_v61  ;;  %v3494_v56 = vand.u32 4294901760, %v67_v58  ;;  %v49_v12 = vsel %vm23_vm0, %v3370_v13, %v42_v33  ;;  %v62_v2 = vsel %vm59_vm2, %v60_v26, %v61_v39  ;;  %v44_v1 = vsel %vm23_vm0, %v42_v33, %v43_v20 }
  0x36   :  { %2268 = vmatpush3.msra.mxu0 %v3002_v31  ;;  %2312 = vmatprep.subr.mxu1 %v2913_v3  ;;  %v3505_v14 = vand.u32 4294901760, %v49_v12  ;;  %v3507_v47 = vand.u32 4294901760, %v62_v2  ;;  %v3514_v61 = vand.u32 4294901760, %v44_v1  ;;  %v63_v3 = vsel %vm59_vm2, %v61_v39, %v60_v26 }
  0x37   :  { %4516 = vst [vmem:[#allocation44_spill] sm:$0xff] %v3494_v56  ;;  %2269 = vmatprep.subr.mxu0 %v3011_v35  ;;  %2313 = vmatpush3.msra.mxu1 %v2915_v4  ;;  %v3512_v49 = vsub.f32 %v67_v58, %v3494_v56  ;;  %v240_v4 = vand.u32 4294901760, %v239_v18 }
  0x38   :  { %4517 = vst [vmem:[#allocation45_spill] sm:$0xff] %v3505_v14  ;;  %4518 = vst [vmem:[#allocation46_spill] sm:$0xff] %v3507_v47  ;;  %2270 = vmatpush3.msra.mxu0 %v3027_v40  ;;  %2314 = vmatprep.subr.mxu1 %v2917_v5  ;;  %v3519_v54 = vsub.f32 %v49_v12, %v3505_v14  ;;  %v3526_v58 = vsub.f32 %v62_v2, %v3507_v47  ;;  %v3540_v2 = vand.u32 4294901760, %v63_v3 }
  0x39   :  { %4519 = vst [vmem:[#allocation47_spill] sm:$0xff] %v3514_v61  ;;  %2271 = vmatprep.subr.mxu0 %v3041_v45  ;;  %2315 = vmatpush3.msra.mxu1 %v2928_v9  ;;  %v4427_v5 = vand.u32 4294901760, %v3512_v49  ;;  %v246_v9 = vand.u32 4294901760, %v245_v44  ;;  %v45_v12 = vsel %vm23_vm0, %v43_v20, %v42_v33  ;;  %v3538_v39 = vsub.f32 %v44_v1, %v3514_v61 }
  0x3a   :  { %2272 = vmatpush3.msra.mxu0 %v3076_v59  ;;  %2316 = vmatprep.subr.mxu1 %v2930_v10  ;;  %v4426_v18 = vand.u32 4294901760, %v3519_v54  ;;  %4520 = vst [vmem:[#allocation48_spill] sm:$0xff] %v3540_v2  ;;  %v4430_v20 = vand.u32 4294901760, %v3526_v58  ;;  %v3549_v44 = vand.u32 4294901760, %v45_v12 }
  0x3b   :  { %2273 = vmatprep.subr.mxu0 %v3091_v0  ;;  %2317 = vmatpush3.msra.mxu1 %v2932_v11  ;;  %v254_v26 = vsub.f32 %v3512_v49, %v4427_v5 }
  0x3c   :  { %2274 = vmatpush3.msra.mxu0 %v3105_v8  ;;  %2318 = vmatprep.subr.mxu1 %v2944_v15  ;;  %v260_v33 = vsub.f32 %v3519_v54, %v4426_v18  ;;  %v3556_v18 = vsub.f32 %v63_v3, %v3540_v2  ;;  %v4521_v3 = vld [vmem:[#allocation11_spill] sm:$0xff] }
  0x3d   :  { %2275 = vmatprep.subr.mxu0 %v3119_v42  ;;  %241 = vmatprep.mubr.f32.mxu0 %v240_v4  ;;  %v255_v1 = vand.u32 4294901760, %v254_v26  ;;  %v4433_v4 = vand.u32 4294901760, %v3538_v39  ;;  %v3566_v26 = vsub.f32 %v45_v12, %v3549_v44 }
  0x3e   :  { %2276 = vmatpush3.msra.mxu0 %v3131_v48  ;;  %2319 = vmatpush3.msra.mxu1 %v2946_v16  ;;  %v261_v5 = vand.u32 4294901760, %v260_v33 }
  0x3f   :  { %2277 = vmatprep.subr.mxu0 %v3148_v21  ;;  %247 = vmatmul.mubr.f32.gmra.mxu0 %v246_v9  ;;  %v269_v9 = vsub.f32 %v3526_v58, %v4430_v20  ;;  %v275_v33 = vsub.f32 %v3538_v39, %v4433_v4  ;;  %v4523_v20 = vld [vmem:[#allocation29_spill] sm:$0xff] }
  0x40   :  { %2278 = vmatpush3.msra.mxu0 %v3160_v6  ;;  %2320 = vmatprep.subr.mxu1 %v2948_v17  ;;  %v4524_v17 = vld [vmem:[#allocation31_spill] sm:$0xff] }
  0x41   :  { %2279 = vmatprep.subr.mxu0 %v3187_v55  ;;  %2321 = vmatpush3.msra.mxu1 %v2970_v22  ;;  %v4522_v22 = vld [vmem:[#allocation27_spill] sm:$0xff]  ;;  %v270_v12 = vand.u32 4294901760, %v269_v9  ;;  %v276_v4 = vand.u32 4294901760, %v275_v33  ;;  %v4527_v9 = vld [vmem:[#allocation14_spill] sm:$0xff]  ;;  %v70_v33 = vrot.slane %v3367_v38, 2 }
  0x42   :  { %2280 = vmatpush3.msra.mxu0 %v3203_v28  ;;  %2322 = vmatprep.subr.mxu1 %v2976_v24  ;;  %v4438_v24 = vand.u32 4294901760, %v3556_v18  ;;  %v4531_v38 = vld [vmem:[#allocation18_spill] sm:$0xff] }
  0x43   :  { %2281 = vmatprep.subr.mxu0 %v3227_v34  ;;  %256 = vmatprep.mubr.f32.mxu0 %v255_v1  ;;  %v4440_v1 = vand.u32 4294901760, %v3566_v26 }
  0x44   :  { %2282 = vmatpush3.msra.mxu0 %v3243_v46  ;;  %2323 = vmatpush3.msra.mxu1 %v4521_v3  ;;  %v4525_v46 = vld [vmem:[#allocation12_spill] sm:$0xff]  ;;  %v4526_v3 = vld [vmem:[#allocation13_spill] sm:$0xff] }
  0x45   :  { %2283 = vmatprep.subr.mxu0 %v4522_v22  ;;  %262 = vmatmul.mubr.f32.gmra.mxu0 %v261_v5  ;;  %v284_v5 = vsub.f32 %v3556_v18, %v4438_v24 }
  0x46   :  { %2284 = vmatpush3.msra.mxu0 %v4523_v20  ;;  %529 = vmatprep.mubr.f32.mxu1 %v3457_v41  ;;  %v290_v41 = vsub.f32 %v3566_v26, %v4440_v1  ;;  %v69_v1 = vrot.slane %v3370_v13, 2  ;;  %v4536_v13 = vld [vmem:[#allocation20_spill] sm:$0xff] }
  0x47   :  { %2285 = vmatprep.subr.mxu0 %v4524_v17  ;;  %2324 = vmatprep.subr.mxu1 %v4525_v46  ;;  %v285_v24 = vand.u32 4294901760, %v284_v5 }
  0x48   :  { %531 = vmatmul.mubr.f32.gmra.mxu1 %v3460_v7  ;;  %2286 = vmatpush3.msra.mxu0 %v3298_v60  ;;  %v4528_v7 = vld [vmem:[#allocation15_spill] sm:$0xff]  ;;  %v3606_v5 = vsel %vm68_vm3, %v70_v33, %v69_v1 }
  0x49   :  { %2325 = vmatpush3.msra.mxu1 %v4526_v3  ;;  %2287 = vmatprep.subr.mxu0 %v3323_v53  ;;  %v4529_v53 = vld [vmem:[#allocation16_spill] sm:$0xff]  ;;  %4533 = vst [vmem:[#allocation29_spill] sm:$0xff] %v3606_v5  ;;  %v4543_v5 = vand.u32 4294901760, %v2973_v23  ;;  %v4550_v23 = vand.u32 4294901760, %v3011_v35  ;;  %v4557_v35 = vand.u32 4294901760, %v3076_v59  ;;  %v4564_v59 = vld [vmem:[#allocation5_spill] sm:$0xff] }
  0x4a   :  { %2326 = vmatprep.subr.mxu1 %v4527_v9  ;;  %271 = vmatprep.mubr.f32.mxu0 %v270_v12  ;;  %v291_v12 = vand.u32 4294901760, %v290_v41  ;;  %v3613_v41 = vsel %vm23_vm0, %v69_v1, %v3473_v51  ;;  %v4541_v51 = vld [vmem:[#allocation8_spill] sm:$0xff] }
  0x4b   :  { %2288 = vmatpush3.msra.mxu0 %v3337_v36  ;;  %2327 = vmatpush3.msra.mxu1 %v4528_v7  ;;  %v4530_v36 = vld [vmem:[#allocation17_spill] sm:$0xff]  ;;  %4535 = vst [vmem:[#allocation31_spill] sm:$0xff] %v3613_v41  ;;  %v4542_v41 = vand.u32 4294901760, %v4541_v51  ;;  %v4549_v51 = vld [vmem:[#allocation30_spill] sm:$0xff] }
  0x4c   :  { %277 = vmatmul.mubr.f32.gmra.mxu0 %v276_v4  ;;  %536 = vmatprep.mubr.f32.mxu1 %v3494_v56  ;;  %v3604_v4 = vsel %vm68_vm3, %v69_v1, %v70_v33  ;;  %v4534_v56 = vld [vmem:[#allocation19_spill] sm:$0xff]  ;;  %v4538_v33 = vld [vmem:[#allocation22_spill] sm:$0xff] }
  0x4d   :  { %2289 = vmatprep.subr.mxu0 %v3348_v57  ;;  %2328 = vmatprep.subr.mxu1 %v4529_v53  ;;  %4532 = vst [vmem:[#allocation27_spill] sm:$0xff] %v3604_v4  ;;  %v4539_v1 = vld [vmem:[#allocation39_spill] sm:$0xff]  ;;  %v4544_v4 = vld [vmem:[#allocation24_spill] sm:$0xff] }
  0x4e   :  { %538 = vmatmul.mubr.f32.gmra.mxu1 %v3505_v14  ;;  %2290 = vmatpush3.msra.mxu0 %v3356_v32  ;;  %v4548_v14 = vand.u32 4294901760, %v3002_v31  ;;  %v4555_v31 = vld [vmem:[#allocation35_spill] sm:$0xff] }
  0x4f   :  { %2329 = vmatpush3.msra.mxu1 %v4530_v36  ;;  %2291 = vmatprep.subr.mxu0 %v3360_v43 }
  0x50   :  { %2330 = vmatprep.subr.mxu1 %v4531_v38  ;;  %286 = vmatprep.mubr.f32.mxu0 %v285_v24  ;;  %v4537_v24 = vld [vmem:[#allocation21_spill] sm:$0xff] }
  0x51   :  { %2292 = vmatpush3.msra.mxu0 %v3390_v62  ;;  %2331 = vmatpush3.msra.mxu1 %v4534_v56 }
  0x52   :  { %292 = vmatmul.mubr.f32.gmra.mxu0 %v291_v12  ;;  %543 = vmatprep.mubr.f32.mxu1 %v3507_v47  ;;  %v4540_v12 = vld [vmem:[#allocation23_spill] sm:$0xff]  ;;  %v4546_v47 = vld [vmem:[#allocation26_spill] sm:$0xff] }
  0x53   :  { %2293 = vmatprep.subr.mxu0 %v3394_v27  ;;  %2332 = vmatprep.subr.mxu1 %v4536_v13 }
  0x54   :  { %545 = vmatmul.mubr.f32.gmra.mxu1 %v3514_v61  ;;  %2294 = vmatpush3.msra.mxu0 %v3412_v19  ;;  %v4545_v61 = vand.u32 4294901760, %v2979_v25  ;;  %v4552_v25 = vand.u32 4294901760, %v3027_v40  ;;  %v4559_v40 = vand.u32 4294901760, %v3091_v0  ;;  %v4566_v0 = vand.u32 4294901760, %v3131_v48 }
  0x55   :  { %2333 = vmatpush3.msra.mxu1 %v4537_v24  ;;  %2295 = vmatprep.subr.mxu0 %v3420_v30  ;;  %v4571_v48 = vand.u32 4294901760, %v3187_v55  ;;  %v4576_v55 = vld [vmem:[#allocation7_spill] sm:$0xff] }
  0x56   :  { %2334 = vmatprep.subr.mxu1 %v4538_v33  ;;  %2296 = vmatpush3.msra.mxu0 %v3437_v37 }
  0x57   :  { %687 = vmatprep.mubr.f32.mxu0 %v3415_v50  ;;  %2335 = vmatpush3.msra.mxu1 %v3199_v63 }
  0x58   :  { %550 = vmatprep.mubr.f32.mxu1 %v3540_v2  ;;  %690 = vmatmul.mubr.f32.vlgmr.msra.gmra.mxu0 %v4539_v1  ;;  %v4547_v2 = vld [vmem:[#allocation28_spill] sm:$0xff] }
  0x59   :  { %2336 = vmatprep.subr.mxu1 %v4540_v12  ;;  %2359 = vmatprep.subr.mxu0 %v4542_v41  ;;  %v4554_v41 = vand.u32 4294901760, %v3041_v45  ;;  %v4560_v45 = vld [vmem:[#allocation3_spill] sm:$0xff] }
  0x5a   :  { %552 = vmatmul.mubr.f32.gmra.mxu1 %v3549_v44  ;;  %2360 = vmatpush3.msra.mxu0 %v4543_v5  ;;  %v4551_v5 = vld [vmem:[#allocation32_spill] sm:$0xff] }
  0x5b   :  { %2337 = vmatpush3.msra.mxu1 %v4544_v4  ;;  %2361 = vmatprep.subr.mxu0 %v4545_v61  ;;  %v4553_v61 = vld [vmem:[#allocation33_spill] sm:$0xff] }
  0x5c   :  { %2338 = vmatprep.subr.mxu1 %v4546_v47  ;;  %696 = vmatprep.mubr.f32.mxu0 %v3466_v29 }
  0x5d   :  { %2339 = vmatpush3.msra.mxu1 %v4547_v2  ;;  %2362 = vmatpush3.msra.mxu0 %v4548_v14  ;;  %v4556_v14 = vand.u32 4294901760, %v3415_v50  ;;  %v4563_v50 = vand.u32 4294901760, %v3119_v42  ;;  %v4569_v42 = vand.u32 4294901760, %v3148_v21  ;;  %v4573_v21 = vand.u32 4294901760, %v3203_v28 }
  0x5e   :  { %699 = vmatmul.mubr.f32.gmra.mxu0 %v3470_v52  ;;  %2340 = vmatprep.subr.mxu1 %v4549_v51  ;;  %v4580_v28 = vand.u32 4294901760, %v4522_v22  ;;  %v4587_v22 = vand.u32 4294901760, %v3298_v60  ;;  %v4594_v60 = vand.u32 4294901760, %v3348_v57  ;;  %v4597_v57 = vand.u32 4294901760, %v3390_v62 }
  0x5f   :  { %2363 = vmatprep.subr.mxu0 %v4550_v23  ;;  %2341 = vmatpush3.msra.mxu1 %v4551_v5  ;;  %v4558_v23 = vand.u32 4294901760, %v4539_v1  ;;  %v4565_v1 = vand.u32 4294901760, %v3466_v29  ;;  %v4572_v29 = vand.u32 4294901760, %v3512_v49  ;;  %v4600_v62 = vand.u32 4294901760, %v3420_v30  ;;  %v4603_v30 = vld [vmem:[#allocation37_spill] sm:$0xff] }
  0x60   :  { %2364 = vmatpush3.msra.mxu0 %v4552_v25  ;;  %2342 = vmatprep.subr.mxu1 %v4553_v61  ;;  %v4561_v25 = vand.u32 4294901760, %v3105_v8  ;;  %v4568_v8 = vand.u32 4294901760, %v3470_v52  ;;  %v4579_v52 = vld [vmem:[#allocation9_spill] sm:$0xff] }
  0x61   :  { %2365 = vmatprep.subr.mxu0 %v4554_v41  ;;  %705 = vmatprep.mubr.f32.mxu0 %v3512_v49  ;;  %v4562_v41 = vld [vmem:[#allocation4_spill] sm:$0xff]  ;;  %v4581_v49 = vld [vmem:[#allocation10_spill] sm:$0xff] }
  0x62   :  { %2343 = vmatpush3.msra.mxu1 %v4555_v31  ;;  %830 = vmatprep.mubr.f32.mxu1 %v4556_v14  ;;  %v4567_v14 = vld [vmem:[#allocation6_spill] sm:$0xff] }
  0x63   :  { %2366 = vmatpush3.msra.mxu0 %v4557_v35  ;;  %834 = vmatmul.mubr.f32.vlgmr.msra.gmra.mxu1 %v4558_v23  ;;  %v4570_v35 = vand.u32 4294901760, %v3160_v6  ;;  %v4585_v23 = vand.u32 4294901760, %v3538_v39 }
  0x64   :  { %708 = vmatmul.mubr.f32.gmra.mxu0 %v3519_v54  ;;  %2367 = vmatprep.subr.mxu0 %v4559_v40  ;;  %v4586_v40 = vand.u32 4294901760, %v4524_v17  ;;  %v124_v17 = vld [vmem:[%s4337_s1 + $0x178] sm:$0xff] }
  0x65   :  { %2406 = vmatprep.subr.mxu1 %v4560_v45  ;;  %2368 = vmatpush3.msra.mxu0 %v4561_v25 }
  0x66   :  { %2407 = vmatpush3.msra.mxu1 %v4562_v41  ;;  %2369 = vmatprep.subr.mxu0 %v4563_v50  ;;  %v4605_v50 = vld [vmem:[#allocation41_spill] sm:$0xff] }
  0x67   :  { %2408 = vmatprep.subr.mxu1 %v4564_v59  ;;  %714 = vmatprep.mubr.f32.mxu0 %v3526_v58 }
  0x68   :  { %841 = vmatprep.mubr.f32.mxu1 %v4565_v1  ;;  %2370 = vmatpush3.msra.mxu0 %v4566_v0 }
  0x69   :  { %2409 = vmatpush3.msra.mxu1 %v4567_v14  ;;  %717 = vmatmul.mubr.f32.gmra.mxu0 %v3538_v39  ;;  %v4591_v39 = vld [vmem:[#allocation36_spill] sm:$0xff] }
  0x6a   :  { %845 = vmatmul.mubr.f32.gmra.mxu1 %v4568_v8  ;;  %2371 = vmatprep.subr.mxu0 %v4569_v42  ;;  %v4592_v25 = vand.u32 4294901760, %v4591_v39  ;;  %v4606_v8 = vld [vmem:[#allocation44_spill] sm:$0xff] }
  0x6b   :  { %2410 = vmatprep.subr.mxu1 %v2930_v10  ;;  %2372 = vmatpush3.msra.mxu0 %v4570_v35  ;;  %v4574_v10 = vand.u32 4294901760, %v3519_v54  ;;  %v4583_v54 = vand.u32 4294901760, %v4523_v20  ;;  %v4590_v20 = vand.u32 4294901760, %v3556_v18  ;;  %v117_v35 = vld [vmem:[%s4337_s1 + $0x140] sm:$0xff] }
  0x6c   :  { %2411 = vmatpush3.msra.mxu1 %v2932_v11  ;;  %2373 = vmatprep.subr.mxu0 %v4571_v48  ;;  %v4575_v11 = vand.u32 4294901760, %v3227_v34  ;;  %v4584_v34 = vld [vmem:[#allocation11_spill] sm:$0xff] }
  0x6d   :  { %2412 = vmatprep.subr.mxu1 %v2944_v15  ;;  %723 = vmatprep.mubr.f32.mxu0 %v3556_v18  ;;  %v4577_v15 = vld [vmem:[#allocation25_spill] sm:$0xff]  ;;  %v4595_v18 = vand.u32 4294901760, %v3356_v32 }
  0x6e   :  { %852 = vmatprep.mubr.f32.mxu1 %v4572_v29  ;;  %2374 = vmatpush3.msra.mxu0 %v4573_v21  ;;  %v4578_v6 = vand.u32 4294901760, %v4577_v15  ;;  %v4607_v21 = vld [vmem:[#allocation45_spill] sm:$0xff]  ;;  %v3851_v15 = vand.u32 4294901760, %v117_v35 }
  0x6f   :  { %2413 = vmatpush3.msra.mxu1 %v2946_v16  ;;  %726 = vmatmul.mubr.f32.gmra.mxu0 %v3566_v26  ;;  %v4582_v16 = vand.u32 4294901760, %v3526_v58  ;;  %v4588_v58 = vld [vmem:[#allocation34_spill] sm:$0xff] }
  0x70   :  { %856 = vmatmul.mubr.f32.gmra.mxu1 %v4574_v10  ;;  %2375 = vmatprep.subr.mxu0 %v4575_v11  ;;  %v4589_v45 = vand.u32 4294901760, %v4588_v58  ;;  %v116_v11 = vld [vmem:[%s4337_s1 + $0x138] sm:$0xff]  ;;  %v114_v58 = vld [vmem:[%s4337_s1 + $0x128] sm:$0xff] }
  0x71   :  { %2414 = vmatprep.subr.mxu1 %v4576_v55  ;;  %2376 = vmatpush3.msra.mxu0 %v4578_v6 }
  0x72   :  { %2415 = vmatpush3.msra.mxu1 %v4579_v52  ;;  %2377 = vmatprep.subr.mxu0 %v4580_v28  ;;  %v4608_v52 = vld [vmem:[#allocation46_spill] sm:$0xff] }
  0x73   :  { %2416 = vmatprep.subr.mxu1 %v4581_v49  ;;  %863 = vmatprep.mubr.f32.mxu1 %v4582_v16  ;;  %v3863_v16 = vand.u32 4294901760, %v116_v11 }
  0x74   :  { %2378 = vmatpush3.msra.mxu0 %v4583_v54  ;;  %2417 = vmatpush3.msra.mxu1 %v4584_v34  ;;  %v115_v54 = vld [vmem:[%s4337_s1 + $0x130] sm:$0xff] }
  0x75   :  { %867 = vmatmul.mubr.f32.gmra.mxu1 %v4585_v23  ;;  %2379 = vmatprep.subr.mxu0 %v4586_v40  ;;  %v4609_v40 = vld [vmem:[#allocation47_spill] sm:$0xff] }
  0x76   :  { %2418 = vmatprep.subr.mxu1 %v4525_v46  ;;  %2380 = vmatpush3.msra.mxu0 %v4587_v22  ;;  %v4593_v46 = vand.u32 4294901760, %v3566_v26  ;;  %v123_v26 = vld [vmem:[%s4337_s1 + $0x170] sm:$0xff]  ;;  %v3873_v22 = vsub.f32 %v117_v35, %v3851_v15 }
  0x77   :  { %2419 = vmatpush3.msra.mxu1 %v4526_v3  ;;  %2381 = vmatprep.subr.mxu0 %v4589_v45  ;;  %v4596_v3 = vand.u32 4294901760, %v3360_v43  ;;  %v3753_v32 = vand.u32 4294901760, %v123_v26  ;;  %v122_v43 = vld [vmem:[%s4337_s1 + $0x168] sm:$0xff] }
  0x78   :  { %2420 = vmatprep.subr.mxu1 %v4527_v9  ;;  %874 = vmatprep.mubr.f32.mxu1 %v4590_v20  ;;  %v3769_v9 = vand.u32 4294901760, %v122_v43  ;;  %v3883_v20 = vand.u32 4294901760, %v115_v54 }
  0x79   :  { %2382 = vmatpush3.msra.mxu0 %v4592_v25  ;;  %2421 = vmatpush3.msra.mxu1 %v4528_v7  ;;  %v3739_v7 = vand.u32 4294901760, %v124_v17  ;;  %v3888_v25 = vsub.f32 %v116_v11, %v3863_v16 }
  0x7a   :  { %878 = vmatmul.mubr.f32.gmra.mxu1 %v4593_v46  ;;  %2383 = vmatprep.subr.mxu0 %v4594_v60  ;;  %v3792_v41 = vsub.f32 %v122_v43, %v3769_v9  ;;  %v113_v46 = vld [vmem:[%s4337_s1 + $0x120] sm:$0xff] }
  0x7b   :  { %2422 = vmatprep.subr.mxu1 %v4529_v53  ;;  %2384 = vmatpush3.msra.mxu0 %v4595_v18  ;;  %v4598_v53 = vand.u32 4294901760, %v3394_v27  ;;  %v4601_v27 = vand.u32 4294901760, %v3437_v37  ;;  %v3898_v18 = vand.u32 4294901760, %v114_v58  ;;  %v3911_v43 = vand.u32 4294901760, %v113_v46 }
  0x7c   :  { %2423 = vmatpush3.msra.mxu1 %v4530_v36  ;;  %2385 = vmatprep.subr.mxu0 %v4596_v3  ;;  %v4599_v36 = vand.u32 4294901760, %v3412_v19  ;;  %v4602_v19 = vld [vmem:[#allocation38_spill] sm:$0xff]  ;;  %v1359_v14 = vand.u32 4294901760, %v3792_v41  ;;  %v4610_v3 = vld [vmem:[#allocation48_spill] sm:$0xff] }
  0x7d   :  { %2424 = vmatprep.subr.mxu1 %v4531_v38  ;;  %2386 = vmatpush3.msra.mxu0 %v4597_v57  ;;  %v121_v38 = vld [vmem:[%s4337_s1 + $0x160] sm:$0xff]  ;;  %v112_v57 = vld [vmem:[%s4337_s1 + $0x118] sm:$0xff] }
  0x7e   :  { %2425 = vmatpush3.msra.mxu1 %v4534_v56  ;;  %2387 = vmatprep.subr.mxu0 %v4598_v53  ;;  %v3762_v56 = vsub.f32 %v124_v17, %v3739_v7  ;;  %v3784_v37 = vand.u32 4294901760, %v121_v38  ;;  %v1360_v10 = vsub.f32 %v3792_v41, %v1359_v14 }
  0x7f   :  { %2426 = vmatprep.subr.mxu1 %v4536_v13  ;;  %2388 = vmatpush3.msra.mxu0 %v4599_v36  ;;  %v3777_v13 = vsub.f32 %v123_v26, %v3753_v32  ;;  %v1394_v26 = vand.u32 4294901760, %v3873_v22  ;;  %v3909_v36 = vsub.f32 %v115_v54, %v3883_v20 }
  0x80   :  { %2427 = vmatpush3.msra.mxu1 %v4537_v24  ;;  %2389 = vmatprep.subr.mxu0 %v4600_v62  ;;  %v2876_v24 = vmov 0.0   ;;  %v1361_v34 = vand.u32 4294901760, %v1360_v10 }
  0x81   :  { %2428 = vmatprep.subr.mxu1 %v4538_v33  ;;  %2390 = vmatpush3.msra.mxu0 %v4601_v27  ;;  %v120_v33 = vld [vmem:[%s4337_s1 + $0x158] sm:$0xff]  ;;  %v4463_v27 = vand.u32 4294901760, %v3888_v25 }
  0x82   :  { %1044 = vmatprep.mubr.f32.mxu0 %v4602_v19  ;;  %2429 = vmatpush3.msra.mxu1 %v3199_v63  ;;  %v1345_v63 = vand.u32 4294901760, %v3762_v56  ;;  %v3802_v59 = vand.u32 4294901760, %v120_v33 }
  0x83   :  { %1046 = vmatmul.mubr.f32.vlgmr.msra.gmra.mxu0 %v4603_v30  ;;  %2430 = vmatprep.subr.mxu1 %v4540_v12  ;;  %v4604_v12 = vld [vmem:[#allocation40_spill] sm:$0xff] }
  0x84   :  { %2579 = vmatprep.subr.mxu0 %v2876_v24  ;;  %2431 = vmatpush3.msra.mxu1 %v4544_v4  ;;  %v1352_v4 = vand.u32 4294901760, %v3777_v13  ;;  %v1346_v1 = vsub.f32 %v3762_v56, %v1345_v63 }
  0x85   :  { %2580 = vmatpush3.msra.mxu0 %v3739_v7  ;;  %2432 = vmatprep.subr.mxu1 %v4546_v47  ;;  %v119_v47 = vld [vmem:[%s4337_s1 + $0x150] sm:$0xff] }
  0x86   :  { %2581 = vmatprep.subr.mxu0 %v2876_v24  ;;  %1051 = vmatprep.mubr.f32.mxu0 %v4604_v12  ;;  %v3814_v0 = vand.u32 4294901760, %v119_v47  ;;  %v1347_v42 = vand.u32 4294901760, %v1346_v1  ;;  %v3938_v1 = vsub.f32 %v113_v46, %v3911_v43 }
  0x87   :  { %2433 = vmatpush3.msra.mxu1 %v4547_v2  ;;  %2582 = vmatpush3.msra.mxu0 %v3753_v32  ;;  %v3810_v2 = vsub.f32 %v121_v38, %v3784_v37 }
  0x88   :  { %1053 = vmatmul.mubr.f32.gmra.mxu0 %v4605_v50  ;;  %2434 = vmatprep.subr.mxu1 %v4549_v51  ;;  %v118_v51 = vld [vmem:[%s4337_s1 + $0x148] sm:$0xff] }
  0x89   :  { %2583 = vmatprep.subr.mxu0 %v2876_v24  ;;  %2435 = vmatpush3.msra.mxu1 %v4551_v5  ;;  %v1353_v5 = vsub.f32 %v3777_v13, %v1352_v4  ;;  %v3835_v48 = vand.u32 4294901760, %v118_v51  ;;  %v1366_v29 = vand.u32 4294901760, %v3810_v2 }
  0x8a   :  { %2584 = vmatpush3.msra.mxu0 %v3769_v9  ;;  %2436 = vmatprep.subr.mxu1 %v4553_v61  ;;  %v3828_v61 = vsub.f32 %v120_v33, %v3802_v59  ;;  %v3924_v33 = vsub.f32 %v114_v58, %v3898_v18 }
  0x8b   :  { %2585 = vmatprep.subr.mxu0 %v2876_v24  ;;  %1058 = vmatprep.mubr.f32.mxu0 %v4606_v8  ;;  %v1354_v55 = vand.u32 4294901760, %v1353_v5  ;;  %v3858_v28 = vsub.f32 %v118_v51, %v3835_v48  ;;  %v1367_v49 = vsub.f32 %v3810_v2, %v1366_v29  ;;  %v4461_v51 = vand.u32 4294901760, %v3909_v36 }
  0x8c   :  { %2437 = vmatpush3.msra.mxu1 %v4555_v31  ;;  %1176 = vmatprep.mubr.f32.mxu1 %v4602_v19  ;;  %v3841_v31 = vsub.f32 %v119_v47, %v3814_v0  ;;  %v1373_v6 = vand.u32 4294901760, %v3828_v61  ;;  %v4611_v19 = vld [vmem:[#allocation27_spill] sm:$0xff]  ;;  %v111_v47 = vld [vmem:[%s4337_s1 + $0x110] sm:$0xff]  ;;  %v4459_v11 = vand.u32 4294901760, %v3924_v33 }
  0x8d   :  { %2586 = vmatpush3.msra.mxu0 %v3784_v37  ;;  %1178 = vmatmul.mubr.f32.vlgmr.msra.gmra.mxu1 %v4603_v30  ;;  %v1368_v39 = vand.u32 4294901760, %v1367_v49  ;;  %v1387_v17 = vand.u32 4294901760, %v3858_v28  ;;  %v3919_v38 = vand.u32 4294901760, %v4611_v19  ;;  %v3949_v35 = vand.u32 4294901760, %v111_v47 }
  0x8e   :  { %1060 = vmatmul.mubr.f32.gmra.mxu0 %v4607_v21  ;;  %2587 = vmatprep.subr.mxu0 %v2876_v24  ;;  %v1380_v23 = vand.u32 4294901760, %v3841_v31  ;;  %v1374_v45 = vsub.f32 %v3828_v61, %v1373_v6  ;;  %v1409_v58 = vsub.f32 %v3909_v36, %v4461_v51 }
  0x8f   :  { %2626 = vmatprep.subr.mxu1 %v2876_v24  ;;  %2588 = vmatpush3.msra.mxu0 %v3802_v59  ;;  %v1388_v62 = vsub.f32 %v3858_v28, %v1387_v17 }
  0x90   :  { %2627 = vmatpush3.msra.mxu1 %v1347_v42  ;;  %2589 = vmatprep.subr.mxu0 %v2876_v24  ;;  %v1381_v60 = vsub.f32 %v3841_v31, %v1380_v23  ;;  %v1375_v53 = vand.u32 4294901760, %v1374_v45  ;;  %v1402_v42 = vsub.f32 %v3888_v25, %v4463_v27  ;;  %v4458_v45 = vand.u32 4294901760, %v3938_v1 }
  0x91   :  { %2628 = vmatprep.subr.mxu1 %v2876_v24  ;;  %1065 = vmatprep.mubr.f32.mxu0 %v4608_v52  ;;  %v1389_v5 = vand.u32 4294901760, %v1388_v62 }
  0x92   :  { %1183 = vmatprep.mubr.f32.mxu1 %v4604_v12  ;;  %2590 = vmatpush3.msra.mxu0 %v3814_v0  ;;  %v1382_v30 = vand.u32 4294901760, %v1381_v60  ;;  %v3926_v12 = vand.u32 4294901760, %v112_v57  ;;  %v1416_v60 = vsub.f32 %v3924_v33, %v4459_v11 }
  0x93   :  { %2629 = vmatpush3.msra.mxu1 %v1354_v55  ;;  %1067 = vmatmul.mubr.f32.gmra.mxu0 %v4609_v40  ;;  %v4612_v55 = vld [vmem:[#allocation29_spill] sm:$0xff] }
  0x94   :  { %1185 = vmatmul.mubr.f32.gmra.mxu1 %v4605_v50  ;;  %2591 = vmatprep.subr.mxu0 %v2876_v24  ;;  %v1395_v50 = vsub.f32 %v3873_v22, %v1394_v26  ;;  %v3957_v10 = vsub.f32 %v112_v57, %v3926_v12 }
  0x95   :  { %2630 = vmatprep.subr.mxu1 %v2876_v24  ;;  %2592 = vmatpush3.msra.mxu0 %v3835_v48 }
  0x96   :  { %2631 = vmatpush3.msra.mxu1 %v1361_v34  ;;  %2593 = vmatprep.subr.mxu0 %v2876_v24  ;;  %v1396_v49 = vand.u32 4294901760, %v1395_v50  ;;  %v109_v34 = vld [vmem:[%s4337_s1 + $0x100] sm:$0xff] }
  0x97   :  { %2632 = vmatprep.subr.mxu1 %v2876_v24  ;;  %1072 = vmatprep.mubr.f32.mxu0 %v4610_v3  ;;  %v3986_v57 = vand.u32 4294901760, %v109_v34 }
  0x98   :  { %1190 = vmatprep.mubr.f32.mxu1 %v4606_v8  ;;  %2594 = vmatpush3.msra.mxu0 %v3851_v15  ;;  %v110_v8 = vld [vmem:[%s4337_s1 + $0x108] sm:$0xff] }
  0x99   :  { %2633 = vmatpush3.msra.mxu1 %v1368_v39  ;;  %1074 = vmatmul.mubr.f32.gmra.mxu0 %v3549_v44  ;;  %v3965_v54 = vand.u32 4294901760, %v110_v8  ;;  %v3978_v39 = vsub.f32 %v111_v47, %v3949_v35  ;;  %v4613_v47 = vld [vmem:[#allocation31_spill] sm:$0xff] }
  0x9a   :  { %1192 = vmatmul.mubr.f32.gmra.mxu1 %v4607_v21  ;;  %2595 = vmatprep.subr.mxu0 %v2876_v24  ;;  %v3953_v21 = vsub.f32 %v4611_v19, %v3919_v38  ;;  %v4003_v50 = vand.u32 4294901760, %v4613_v47 }
  0x9b   :  { %2634 = vmatprep.subr.mxu1 %v2876_v24  ;;  %2596 = vmatpush3.msra.mxu0 %v3863_v16  ;;  %v3995_v19 = vsub.f32 %v110_v8, %v3965_v54 }
  0x9c   :  { %2635 = vmatpush3.msra.mxu1 %v1375_v53  ;;  %2597 = vmatprep.subr.mxu0 %v2876_v24  ;;  %v1294_v46 = vand.u32 4294901760, %v3953_v21  ;;  %v4457_v53 = vand.u32 4294901760, %v3957_v10 }
  0x9d   :  { %2636 = vmatprep.subr.mxu1 %v2876_v24  ;;  %1197 = vmatprep.mubr.f32.mxu1 %v4608_v52  ;;  %v3961_v52 = vand.u32 4294901760, %v4612_v55 }
  0x9e   :  { %2598 = vmatpush3.msra.mxu0 %v3883_v20  ;;  %2637 = vmatpush3.msra.mxu1 %v1382_v30  ;;  %v1423_v30 = vsub.f32 %v3938_v1, %v4458_v45  ;;  %v1295_v8 = vsub.f32 %v3953_v21, %v1294_v46  ;;  %v4614_v45 = vld [vmem:[#allocation43_spill] sm:$0xff] }
  0x9f   :  { %1199 = vmatmul.mubr.f32.gmra.mxu1 %v4609_v40  ;;  %2599 = vmatprep.subr.mxu0 %v2876_v24  ;;  %v1403_v40 = vand.u32 4294901760, %v1402_v42  ;;  %v3991_v62 = vsub.f32 %v4612_v55, %v3961_v52  ;;  %v4013_v42 = vsub.f32 %v109_v34, %v3986_v57  ;;  %v1430_v55 = vsub.f32 %v3957_v10, %v4457_v53 }
  0xa0   :  { %2638 = vmatprep.subr.mxu1 %v2876_v24  ;;  %2600 = vmatpush3.msra.mxu0 %v3898_v18  ;;  %v4025_v34 = vsub.f32 %v4613_v47, %v4003_v50  ;;  %v4033_v11 = vand.u32 4294901760, %v4614_v45 }
  0xa1   :  { %2639 = vmatpush3.msra.mxu1 %v1389_v5  ;;  %2601 = vmatprep.subr.mxu0 %v2876_v24  ;;  %v1417_v5 = vand.u32 4294901760, %v1416_v60  ;;  %v1296_v60 = vand.u32 4294901760, %v1295_v8  ;;  %v1450_v47 = vand.u32 4294901760, %v4013_v42 }
  0xa2   :  { %2640 = vmatprep.subr.mxu1 %v2876_v24  ;;  %1204 = vmatprep.mubr.f32.mxu1 %v4610_v3  ;;  %v1410_v3 = vand.u32 4294901760, %v1409_v58  ;;  %v4462_v58 = vand.u32 4294901760, %v3995_v19 }
  0xa3   :  { %2602 = vmatpush3.msra.mxu0 %v3911_v43  ;;  %2641 = vmatpush3.msra.mxu1 %v1396_v49  ;;  %v1304_v49 = vand.u32 4294901760, %v3991_v62 }
  0xa4   :  { %1206 = vmatmul.mubr.f32.gmra.mxu1 %v3549_v44  ;;  %2603 = vmatprep.subr.mxu0 %v2876_v24  ;;  %v4460_v44 = vand.u32 4294901760, %v3978_v39  ;;  %v1444_v8 = vsub.f32 %v3995_v19, %v4462_v58  ;;  %v1451_v58 = vsub.f32 %v4013_v42, %v1450_v47 }
  0xa5   :  { %2642 = vmatprep.subr.mxu1 %v2876_v24  ;;  %2604 = vmatpush3.msra.mxu0 %v3926_v12 }
  0xa6   :  { %2643 = vmatpush3.msra.mxu1 %v1403_v40  ;;  %2605 = vmatprep.subr.mxu0 %v2876_v24  ;;  %v1424_v40 = vand.u32 4294901760, %v1423_v30  ;;  %v1437_v53 = vsub.f32 %v3978_v39, %v4460_v44  ;;  %v1305_v30 = vsub.f32 %v3991_v62, %v1304_v49  ;;  %v4051_v44 = vsub.f32 %v4614_v45, %v4033_v11 }
  0xa7   :  { %2644 = vmatprep.subr.mxu1 %v2876_v24  ;;  %2606 = vmatpush3.msra.mxu0 %v3949_v35 }
  0xa8   :  { %2645 = vmatpush3.msra.mxu1 %v1410_v3  ;;  %2607 = vmatprep.subr.mxu0 %v2876_v24  ;;  %v1431_v3 = vand.u32 4294901760, %v1430_v55  ;;  %v1438_v55 = vand.u32 4294901760, %v1437_v53  ;;  %v1306_v51 = vand.u32 4294901760, %v1305_v30  ;;  %v1324_v53 = vand.u32 4294901760, %v4051_v44 }
  0xa9   :  { %2646 = vmatprep.subr.mxu1 %v2876_v24  ;;  %2608 = vmatpush3.msra.mxu0 %v3965_v54 }
  0xaa   :  { %2647 = vmatpush3.msra.mxu1 %v1417_v5  ;;  %2609 = vmatprep.subr.mxu0 %v2876_v24  ;;  %v1314_v5 = vand.u32 4294901760, %v4025_v34 }
  0xab   :  { %2648 = vmatprep.subr.mxu1 %v2876_v24  ;;  %2610 = vmatpush3.msra.mxu0 %v3986_v57 }
  0xac   :  { %2611 = vmatprep.mubr.msk.f32.mxu0 %vm2877_vm4, %v2876_v24  ;;  %2649 = vmatpush3.msra.mxu1 %v1424_v40  ;;  %v1445_v40 = vand.u32 4294901760, %v1444_v8  ;;  %v1315_v45 = vsub.f32 %v4025_v34, %v1314_v5 }
  0xad   :  { %2612 = vmatmul.mubr.f32.vlgmr.msra.gmra.mxu0 %v1296_v60  ;;  %2650 = vmatprep.subr.mxu1 %v2876_v24  ;;  %v4615_v60 = vld [vmem:[#allocation42_spill] sm:$0xff] }
  0xae   :  { %2673 = vmatprep.subr.mxu0 %v2876_v24  ;;  %2651 = vmatpush3.msra.mxu1 %v1431_v3  ;;  %v4060_v27 = vand.u32 4294901760, %v4615_v60  ;;  %v1452_v3 = vand.u32 4294901760, %v1451_v58  ;;  %v1316_v8 = vand.u32 4294901760, %v1315_v45 }
  0xaf   :  { %2674 = vmatpush3.msra.mxu0 %v3762_v56  ;;  %2652 = vmatprep.subr.mxu1 %v2876_v24 }
  0xb0   :  { %2675 = vmatprep.subr.mxu0 %v2876_v24  ;;  %2614 = vmatprep.mubr.msk.f32.mxu0 %vm2877_vm4, %v2876_v24  ;;  %v4074_v30 = vsub.f32 %v4615_v60, %v4060_v27 }
  0xb1   :  { %2653 = vmatpush3.msra.mxu1 %v1438_v55  ;;  %2676 = vmatpush3.msra.mxu0 %v3777_v13 }
  0xb2   :  { %2615 = vmatmul.mubr.f32.gmra.mxu0 %v1306_v51  ;;  %2654 = vmatprep.subr.mxu1 %v2876_v24  ;;  %v1325_v51 = vsub.f32 %v4051_v44, %v1324_v53  ;;  %v1334_v58 = vand.u32 4294901760, %v4074_v30 }
  0xb3   :  { %2677 = vmatprep.subr.mxu0 %v2876_v24  ;;  %2655 = vmatpush3.msra.mxu1 %v1445_v40 }
  0xb4   :  { %2678 = vmatpush3.msra.mxu0 %v3792_v41  ;;  %2656 = vmatprep.subr.mxu1 %v2876_v24  ;;  %v1326_v55 = vand.u32 4294901760, %v1325_v51  ;;  %v1335_v40 = vsub.f32 %v4074_v30, %v1334_v58  ;;  %v4619_v41 = vand.u32 4294901760, %v3938_v1 }
  0xb5   :  { %2679 = vmatprep.subr.mxu0 %v2876_v24  ;;  %2617 = vmatprep.mubr.msk.f32.mxu0 %vm2877_vm4, %v2876_v24 }
  0xb6   :  { %2657 = vmatpush3.msra.mxu1 %v1452_v3  ;;  %2658 = vmatprep.mubr.msk.f32.mxu1 %vm2877_vm4, %v2876_v24  ;;  %v1336_v60 = vand.u32 4294901760, %v1335_v40 }
  0xb7   :  { %2680 = vmatpush3.msra.mxu0 %v3810_v2  ;;  %2659 = vmatmul.mubr.f32.vlgmr.msra.gmra.mxu1 %v3919_v38  ;;  %v4620_v2 = vand.u32 4294901760, %v3957_v10 }
  0xb8   :  { %2618 = vmatmul.mubr.f32.gmra.mxu0 %v1316_v8  ;;  %2681 = vmatprep.subr.mxu0 %v2876_v24 }
  0xb9   :  { %2720 = vmatprep.subr.mxu1 %v2876_v24  ;;  %2682 = vmatpush3.msra.mxu0 %v3828_v61  ;;  %v4622_v61 = vand.u32 4294901760, %v3995_v19 }
  0xba   :  { %2721 = vmatpush3.msra.mxu1 %v3739_v7  ;;  %2683 = vmatprep.subr.mxu0 %v2876_v24 }
  0xbb   :  { %2722 = vmatprep.subr.mxu1 %v2876_v24  ;;  %2620 = vmatprep.mubr.msk.f32.mxu0 %vm2877_vm4, %v2876_v24 }
  0xbc   :  { %2661 = vmatprep.mubr.msk.f32.mxu1 %vm2877_vm4, %v2876_v24  ;;  %2684 = vmatpush3.msra.mxu0 %v3841_v31 }
  0xbd   :  { %2723 = vmatpush3.msra.mxu1 %v3753_v32  ;;  %2621 = vmatmul.mubr.f32.gmra.mxu0 %v1326_v55 }
  0xbe   :  { %2662 = vmatmul.mubr.f32.gmra.mxu1 %v3961_v52  ;;  %2685 = vmatprep.subr.mxu0 %v2876_v24 }
  0xbf   :  { %2724 = vmatprep.subr.mxu1 %v2876_v24  ;;  %2686 = vmatpush3.msra.mxu0 %v3858_v28 }
  0xc0   :  { %2725 = vmatpush3.msra.mxu1 %v3769_v9  ;;  %2687 = vmatprep.subr.mxu0 %v2876_v24 }
  0xc1   :  { %2726 = vmatprep.subr.mxu1 %v2876_v24  ;;  %2623 = vmatprep.mubr.msk.f32.mxu0 %vm2877_vm4, %v2876_v24 }
  0xc2   :  { %2664 = vmatprep.mubr.msk.f32.mxu1 %vm2877_vm4, %v2876_v24  ;;  %2688 = vmatpush3.msra.mxu0 %v3873_v22 }
  0xc3   :  { %2727 = vmatpush3.msra.mxu1 %v3784_v37  ;;  %2624 = vmatmul.mubr.f32.gmra.mxu0 %v1336_v60 }
  0xc4   :  { %2665 = vmatmul.mubr.f32.gmra.mxu1 %v4003_v50  ;;  %2689 = vmatprep.subr.mxu0 %v2876_v24 }
  0xc5   :  { %2728 = vmatprep.subr.mxu1 %v2876_v24  ;;  %2690 = vmatpush3.msra.mxu0 %v3888_v25 }
  0xc6   :  { %2729 = vmatpush3.msra.mxu1 %v3802_v59  ;;  %2691 = vmatprep.subr.mxu0 %v2876_v24 }
  0xc7   :  { %2730 = vmatprep.subr.mxu1 %v2876_v24  ;;  %2667 = vmatprep.mubr.msk.f32.mxu1 %vm2877_vm4, %v2876_v24 }
  0xc8   :  { %2692 = vmatpush3.msra.mxu0 %v3909_v36  ;;  %2731 = vmatpush3.msra.mxu1 %v3814_v0 }
  0xc9   :  { %2668 = vmatmul.mubr.f32.gmra.mxu1 %v4033_v11  ;;  %2693 = vmatprep.subr.mxu0 %v2876_v24 }
  0xca   :  { %2732 = vmatprep.subr.mxu1 %v2876_v24  ;;  %2694 = vmatpush3.msra.mxu0 %v3924_v33 }
  0xcb   :  { %2733 = vmatpush3.msra.mxu1 %v3835_v48  ;;  %2695 = vmatprep.subr.mxu0 %v2876_v24 }
  0xcc   :  { %2734 = vmatprep.subr.mxu1 %v2876_v24  ;;  %2670 = vmatprep.mubr.msk.f32.mxu1 %vm2877_vm4, %v2876_v24 }
  0xcd   :  { %2696 = vmatpush3.msra.mxu0 %v3938_v1  ;;  %2735 = vmatpush3.msra.mxu1 %v3851_v15 }
  0xce   :  { %2671 = vmatmul.mubr.f32.gmra.mxu1 %v4060_v27  ;;  %2697 = vmatprep.subr.mxu0 %v2876_v24 }
  0xcf   :  { %2736 = vmatprep.subr.mxu1 %v2876_v24  ;;  %2698 = vmatpush3.msra.mxu0 %v3957_v10 }
  0xd0   :  { %2737 = vmatpush3.msra.mxu1 %v3863_v16  ;;  %2699 = vmatprep.subr.mxu0 %v2876_v24 }
  0xd1   :  { %2738 = vmatprep.subr.mxu1 %v2876_v24  ;;  %2700 = vmatpush3.msra.mxu0 %v3978_v39 }
  0xd2   :  { %2739 = vmatpush3.msra.mxu1 %v3883_v20  ;;  %2701 = vmatprep.subr.mxu0 %v2876_v24 }
  0xd3   :  { %2740 = vmatprep.subr.mxu1 %v2876_v24  ;;  %2702 = vmatpush3.msra.mxu0 %v3995_v19 }
  0xd4   :  { %2741 = vmatpush3.msra.mxu1 %v3898_v18  ;;  %2703 = vmatprep.subr.mxu0 %v2876_v24 }
  0xd5   :  { %2742 = vmatprep.subr.mxu1 %v2876_v24  ;;  %2704 = vmatpush3.msra.mxu0 %v4013_v42 }
  0xd6   :  { %2705 = vmatprep.mubr.msk.f32.mxu0 %vm2877_vm4, %v2876_v24  ;;  %2743 = vmatpush3.msra.mxu1 %v3911_v43 }
  0xd7   :  { %2706 = vmatmul.mubr.f32.vlgmr.msra.gmra.mxu0 %v3953_v21  ;;  %2744 = vmatprep.subr.mxu1 %v2876_v24 }
  0xd8   :  { %2767 = vmatprep.subr.mxu0 %v2876_v24  ;;  %2745 = vmatpush3.msra.mxu1 %v3926_v12 }
  0xd9   :  { %2768 = vmatpush3.msra.mxu0 %v1345_v63  ;;  %2746 = vmatprep.subr.mxu1 %v2876_v24 }
  0xda   :  { %2769 = vmatprep.subr.mxu0 %v2876_v24  ;;  %2708 = vmatprep.mubr.msk.f32.mxu0 %vm2877_vm4, %v2876_v24 }
  0xdb   :  { %2747 = vmatpush3.msra.mxu1 %v3949_v35  ;;  %2770 = vmatpush3.msra.mxu0 %v1352_v4 }
  0xdc   :  { %2709 = vmatmul.mubr.f32.gmra.mxu0 %v3991_v62  ;;  %2748 = vmatprep.subr.mxu1 %v2876_v24 }
  0xdd   :  { %2771 = vmatprep.subr.mxu0 %v2876_v24  ;;  %2749 = vmatpush3.msra.mxu1 %v3965_v54 }
  0xde   :  { %2772 = vmatpush3.msra.mxu0 %v1359_v14  ;;  %2750 = vmatprep.subr.mxu1 %v2876_v24  ;;  %v4621_v14 = vand.u32 4294901760, %v3978_v39 }
  0xdf   :  { %2773 = vmatprep.subr.mxu0 %v2876_v24  ;;  %2711 = vmatprep.mubr.msk.f32.mxu0 %vm2877_vm4, %v2876_v24 }
  0xe0   :  { %2751 = vmatpush3.msra.mxu1 %v3986_v57  ;;  %2752 = vmatprep.mubr.msk.f32.mxu1 %vm2877_vm4, %v2876_v24 }
  0xe1   :  { %2774 = vmatpush3.msra.mxu0 %v1366_v29  ;;  %2753 = vmatmul.mubr.f32.vlgmr.msra.gmra.mxu1 %v1294_v46 }
  0xe2   :  { %2712 = vmatmul.mubr.f32.gmra.mxu0 %v4025_v34  ;;  %2775 = vmatprep.subr.mxu0 %v2876_v24 }
  0xe3   :  { %2814 = vmatprep.subr.mxu1 %v2876_v24  ;;  %2776 = vmatpush3.msra.mxu0 %v1373_v6 }
  0xe4   :  { %2815 = vmatpush3.msra.mxu1 %v3739_v7  ;;  %2777 = vmatprep.subr.mxu0 %v2876_v24  ;;  %v4616_v7 = vand.u32 4294901760, %v3888_v25 }
  0xe5   :  { %2816 = vmatprep.subr.mxu1 %v2876_v24  ;;  %2714 = vmatprep.mubr.msk.f32.mxu0 %vm2877_vm4, %v2876_v24 }
  0xe6   :  { %2755 = vmatprep.mubr.msk.f32.mxu1 %vm2877_vm4, %v2876_v24  ;;  %2778 = vmatpush3.msra.mxu0 %v1380_v23 }
  0xe7   :  { %2817 = vmatpush3.msra.mxu1 %v3753_v32  ;;  %2715 = vmatmul.mubr.f32.gmra.mxu0 %v4051_v44  ;;  %v4617_v32 = vand.u32 4294901760, %v3909_v36 }
  0xe8   :  { %2756 = vmatmul.mubr.f32.gmra.mxu1 %v1304_v49  ;;  %2779 = vmatprep.subr.mxu0 %v2876_v24 }
  0xe9   :  { %2818 = vmatprep.subr.mxu1 %v2876_v24  ;;  %2780 = vmatpush3.msra.mxu0 %v1387_v17 }
  0xea   :  { %2819 = vmatpush3.msra.mxu1 %v3769_v9  ;;  %2781 = vmatprep.subr.mxu0 %v2876_v24  ;;  %v4618_v9 = vand.u32 4294901760, %v3924_v33 }
  0xeb   :  { %2820 = vmatprep.subr.mxu1 %v2876_v24  ;;  %2717 = vmatprep.mubr.msk.f32.mxu0 %vm2877_vm4, %v2876_v24 }
  0xec   :  { %2758 = vmatprep.mubr.msk.f32.mxu1 %vm2877_vm4, %v2876_v24  ;;  %2782 = vmatpush3.msra.mxu0 %v1394_v26 }
  0xed   :  { %2821 = vmatpush3.msra.mxu1 %v3784_v37  ;;  %2718 = vmatmul.mubr.f32.gmra.mxu0 %v4074_v30 }
  0xee   :  { %2759 = vmatmul.mubr.f32.gmra.mxu1 %v1314_v5  ;;  %2783 = vmatprep.subr.mxu0 %v2876_v24 }
  0xef   :  { %2822 = vmatprep.subr.mxu1 %v2876_v24  ;;  %2784 = vmatpush3.msra.mxu0 %v4616_v7 }
  0xf0   :  { %2823 = vmatpush3.msra.mxu1 %v3802_v59  ;;  %2785 = vmatprep.subr.mxu0 %v2876_v24 }
  0xf1   :  { %2824 = vmatprep.subr.mxu1 %v2876_v24  ;;  %2761 = vmatprep.mubr.msk.f32.mxu1 %vm2877_vm4, %v2876_v24 }
  0xf2   :  { %2786 = vmatpush3.msra.mxu0 %v4617_v32  ;;  %2825 = vmatpush3.msra.mxu1 %v3814_v0 }
  0xf3   :  { %2762 = vmatmul.mubr.f32.gmra.mxu1 %v1324_v53  ;;  %2787 = vmatprep.subr.mxu0 %v2876_v24  ;;  %v2203_v56 = vpop.f32.mrf.mxu0 }
  0xf4   :  { %2826 = vmatprep.subr.mxu1 %v2876_v24  ;;  %2788 = vmatpush3.msra.mxu0 %v4618_v9 }
  0xf5   :  { %2827 = vmatpush3.msra.mxu1 %v3835_v48  ;;  %2789 = vmatprep.subr.mxu0 %v2876_v24  ;;  %v2204_v13 = vpop.f32.mrf.mxu0  ;;  %v2250_v63 = vpop.f32.mrf.mxu1 }
  0xf6   :  { %2828 = vmatprep.subr.mxu1 %v2876_v24  ;;  %2764 = vmatprep.mubr.msk.f32.mxu1 %vm2877_vm4, %v2876_v24  ;;  %v2205_v37 = vadd.f32 %v2204_v13, %v2203_v56 }
  0xf7   :  { %2790 = vmatpush3.msra.mxu0 %v4619_v41  ;;  %2829 = vmatpush3.msra.mxu1 %v3851_v15  ;;  %v2251_v4 = vpop.f32.mrf.mxu1 }
  0xf8   :  { %2765 = vmatmul.mubr.f32.gmra.mxu1 %v1334_v58  ;;  %2791 = vmatprep.subr.mxu0 %v2876_v24  ;;  %v2252_v59 = vadd.f32 %v2251_v4, %v2250_v63 }
  0xf9   :  { %2830 = vmatprep.subr.mxu1 %v2876_v24  ;;  %2792 = vmatpush3.msra.mxu0 %v4620_v2 }
  0xfa   :  { %2831 = vmatpush3.msra.mxu1 %v3863_v16  ;;  %2793 = vmatprep.subr.mxu0 %v2876_v24  ;;  %v4257_v0 = vadd.f32 %v2252_v59, %v2205_v37 }
  0xfb   :  { %2832 = vmatprep.subr.mxu1 %v2876_v24  ;;  %2794 = vmatpush3.msra.mxu0 %v4621_v14 }
  0xfc   :  { %2833 = vmatpush3.msra.mxu1 %v3883_v20  ;;  %2795 = vmatprep.subr.mxu0 %v2876_v24 }
  0xfd   :  { %2834 = vmatprep.subr.mxu1 %v2876_v24  ;;  %2796 = vmatpush3.msra.mxu0 %v4622_v61 }
  0xfe   :  { %2835 = vmatpush3.msra.mxu1 %v3898_v18  ;;  %2797 = vmatprep.subr.mxu0 %v2876_v24 }
  0xff   :  { %2836 = vmatprep.subr.mxu1 %v2876_v24  ;;  %2798 = vmatpush3.msra.mxu0 %v1450_v47  ;;  %v2206_v48 = vpop.f32.mrf.mxu0 }
 0x100   :  { %2799 = vmatprep.mubr.msk.f32.mxu0 %vm2877_vm4, %v2876_v24  ;;  %2837 = vmatpush3.msra.mxu1 %v3911_v43 }
 0x101   :  { %2800 = vmatmul.mubr.f32.vlgmr.msra.gmra.mxu0 %v3919_v38  ;;  %2838 = vmatprep.subr.mxu1 %v2876_v24  ;;  %v2207_v29 = vpop.f32.mrf.mxu0 }
 0x102   :  { %2839 = vmatpush3.msra.mxu1 %v3926_v12  ;;  %2802 = vmatprep.mubr.msk.f32.mxu0 %vm2877_vm4, %v2876_v24  ;;  %v2208_v31 = vadd.f32 %v2207_v29, %v2206_v48 }
 0x103   :  { %2840 = vmatprep.subr.mxu1 %v2876_v24  ;;  %2846 = vmatprep.mubr.msk.f32.mxu1 %vm2877_vm4, %v2876_v24 }
 0x104   :  { %2841 = vmatpush3.msra.mxu1 %v3949_v35 }
 0x105   :  { %2803 = vmatmul.mubr.f32.gmra.mxu0 %v3961_v52  ;;  %2842 = vmatprep.subr.mxu1 %v2876_v24  ;;  %v2209_v15 = vpop.f32.mrf.mxu0 }
 0x106   :  { %2843 = vmatpush3.msra.mxu1 %v3965_v54  ;;  %2805 = vmatprep.mubr.msk.f32.mxu0 %vm2877_vm4, %v2876_v24 }
 0x107   :  { %2844 = vmatprep.subr.mxu1 %v2876_v24  ;;  %v2210_v6 = vpop.f32.mrf.mxu0 }
 0x108   :  { %2845 = vmatpush3.msra.mxu1 %v3986_v57  ;;  %v2253_v28 = vpop.f32.mrf.mxu1  ;;  %v2211_v16 = vadd.f32 %v2210_v6, %v2209_v15 }
 0x109   :  { %2806 = vmatmul.mubr.f32.gmra.mxu0 %v4003_v50  ;;  %2847 = vmatmul.mubr.f32.vlgmr.msra.gmra.mxu1 %v3919_v38 }
 0x10a   :  { %2808 = vmatprep.mubr.msk.f32.mxu0 %vm2877_vm4, %v2876_v24  ;;  %2849 = vmatprep.mubr.msk.f32.mxu1 %vm2877_vm4, %v2876_v24  ;;  %v2254_v23 = vpop.f32.mrf.mxu1 }
 0x10b   :  { %v2255_v22 = vadd.f32 %v2254_v23, %v2253_v28 }
 0x10c   :  { %v2212_v20 = vpop.f32.mrf.mxu0 }
 0x10d   :  { %2809 = vmatmul.mubr.f32.gmra.mxu0 %v4033_v11  ;;  %2850 = vmatmul.mubr.f32.gmra.mxu1 %v3961_v52  ;;  %v533_v25 = vadd.f32 %v2255_v22, %v2208_v31 }
 0x10e   :  { %2811 = vmatprep.mubr.msk.f32.mxu0 %vm2877_vm4, %v2876_v24  ;;  %2852 = vmatprep.mubr.msk.f32.mxu1 %vm2877_vm4, %v2876_v24  ;;  %v2256_v17 = vpop.f32.mrf.mxu1  ;;  %v2213_v18 = vpop.f32.mrf.mxu0 }
 0x10f   :  { %v2214_v26 = vadd.f32 %v2213_v18, %v2212_v20 }
 0x110   :  { %v2257_v36 = vpop.f32.mrf.mxu1 }
 0x111   :  { %2812 = vmatmul.mubr.f32.gmra.mxu0 %v4060_v27  ;;  %2853 = vmatmul.mubr.f32.gmra.mxu1 %v4003_v50  ;;  %v2258_v43 = vadd.f32 %v2257_v36, %v2256_v17 }
 0x112   :  { %2855 = vmatprep.mubr.msk.f32.mxu1 %vm2877_vm4, %v2876_v24  ;;  %v2215_v38 = vpop.f32.mrf.mxu0 }
 0x113   :  { %v540_v33 = vadd.f32 %v2258_v43, %v2211_v16 }
 0x114   :  { %v2259_v12 = vpop.f32.mrf.mxu1  ;;  %v2216_v1 = vpop.f32.mrf.mxu0 }
 0x115   :  { %2856 = vmatmul.mubr.f32.gmra.mxu1 %v4033_v11  ;;  %v2217_v35 = vadd.f32 %v2216_v1, %v2215_v38 }
 0x116   :  { %2858 = vmatprep.mubr.msk.f32.mxu1 %vm2877_vm4, %v2876_v24  ;;  %v2260_v21 = vpop.f32.mrf.mxu1 }
 0x117   :  { %v2261_v10 = vadd.f32 %v2260_v21, %v2259_v12 }
 0x118   :  { %v2297_v52 = vpop.f32.mrf.mxu0 }
 0x119   :  { %2859 = vmatmul.mubr.f32.gmra.mxu1 %v4060_v27  ;;  %v547_v54 = vadd.f32 %v2261_v10, %v2214_v26 }
 0x11a   :  { %v2262_v39 = vpop.f32.mrf.mxu1  ;;  %v2298_v46 = vpop.f32.mrf.mxu0 }
 0x11b   :  { %v2299_v57 = vadd.f32 %v2298_v46, %v2297_v52 }
 0x11c   :  { %v2263_v62 = vpop.f32.mrf.mxu1 }
 0x11d   :  { %v692_v19 = vadd.f32 %v2299_v57, %v4257_v0  ;;  %v2264_v50 = vadd.f32 %v2263_v62, %v2262_v39 }
 0x11e   :  { %v2300_v44 = vpop.f32.mrf.mxu0 }
 0x11f   :  { %v554_v42 = vadd.f32 %v2264_v50, %v2217_v35 }
 0x120   :  { %v2301_v11 = vpop.f32.mrf.mxu0 }
 0x121   :  { %v2302_v49 = vadd.f32 %v2301_v11, %v2300_v44 }
 0x123   :  { %v701_v34 = vadd.f32 %v2302_v49, %v533_v25  ;;  %v2344_v47 = vpop.f32.mrf.mxu1 }
 0x124   :  { %v2303_v24 = vpop.f32.mrf.mxu0 }
 0x125   :  { %v2345_v5 = vpop.f32.mrf.mxu1 }
 0x126   :  { %v2304_v45 = vpop.f32.mrf.mxu0  ;;  %v2346_v53 = vadd.f32 %v2345_v5, %v2344_v47 }
 0x127   :  { %v2305_v3 = vadd.f32 %v2304_v45, %v2303_v24 }
 0x128   :  { %v836_v27 = vadd.f32 %v2346_v53, %v692_v19 }
 0x129   :  { %v710_v30 = vadd.f32 %v2305_v3, %v540_v33  ;;  %v2306_v8 = vpop.f32.mrf.mxu0 }
 0x12a   :  { %v2347_v51 = vpop.f32.mrf.mxu1 }
 0x12b   :  { %v2307_v58 = vpop.f32.mrf.mxu0 }
 0x12c   :  { %v2308_v55 = vadd.f32 %v2307_v58, %v2306_v8  ;;  %v2348_v40 = vpop.f32.mrf.mxu1 }
 0x12d   :  { %v2349_v60 = vadd.f32 %v2348_v40, %v2347_v51 }
 0x12e   :  { %v719_v7 = vadd.f32 %v2308_v55, %v547_v54 }
 0x12f   :  { %v847_v32 = vadd.f32 %v2349_v60, %v701_v34  ;;  %v2309_v56 = vpop.f32.mrf.mxu0 }
 0x130   :  { %v2350_v9 = vpop.f32.mrf.mxu1 }
 0x131   :  { %v2310_v13 = vpop.f32.mrf.mxu0 }
 0x132   :  { %v2311_v63 = vadd.f32 %v2310_v13, %v2309_v56  ;;  %v2351_v37 = vpop.f32.mrf.mxu1 }
 0x133   :  { %v2352_v41 = vadd.f32 %v2351_v37, %v2350_v9 }
 0x134   :  { %v728_v4 = vadd.f32 %v2311_v63, %v554_v42 }
 0x135   :  { %v858_v59 = vadd.f32 %v2352_v41, %v710_v30  ;;  %v2353_v2 = vpop.f32.mrf.mxu1 }
 0x137   :  { %v2354_v0 = vpop.f32.mrf.mxu1 }
 0x138   :  { %v2355_v14 = vadd.f32 %v2354_v0, %v2353_v2 }
 0x13a   :  { %v869_v61 = vadd.f32 %v2355_v14, %v719_v7  ;;  %v2356_v48 = vpop.f32.mrf.mxu1 }
 0x13c   :  { %v2357_v29 = vpop.f32.mrf.mxu1 }
 0x13d   :  { %v2358_v31 = vadd.f32 %v2357_v29, %v2356_v48 }
 0x13f   :  { %v880_v15 = vadd.f32 %v2358_v31, %v728_v4 }
 0x143   :  { %v2391_v6 = vpop.f32.mrf.mxu0 }
 0x145   :  { %v2392_v28 = vpop.f32.mrf.mxu0 }
 0x146   :  { %v2393_v16 = vadd.f32 %v2392_v28, %v2391_v6 }
 0x148   :  { %v1048_v23 = vadd.f32 %v2393_v16, %v836_v27  ;;  %v2394_v22 = vpop.f32.mrf.mxu0 }
 0x14a   :  { %v2395_v20 = vpop.f32.mrf.mxu0 }
 0x14b   :  { %v2396_v25 = vadd.f32 %v2395_v20, %v2394_v22 }
 0x14d   :  { %v1055_v17 = vadd.f32 %v2396_v25, %v847_v32  ;;  %v2438_v18 = vpop.f32.mrf.mxu1 }
 0x14e   :  { %v2397_v26 = vpop.f32.mrf.mxu0 }
 0x14f   :  { %v2439_v36 = vpop.f32.mrf.mxu1 }
 0x150   :  { %v2398_v43 = vpop.f32.mrf.mxu0  ;;  %v2440_v38 = vadd.f32 %v2439_v36, %v2438_v18 }
 0x151   :  { %v2399_v33 = vadd.f32 %v2398_v43, %v2397_v26 }
 0x152   :  { %v1180_v12 = vadd.f32 %v2440_v38, %v1048_v23 }
 0x153   :  { %v1062_v1 = vadd.f32 %v2399_v33, %v858_v59  ;;  %v2400_v35 = vpop.f32.mrf.mxu0 }
 0x154   :  { %v2441_v21 = vpop.f32.mrf.mxu1 }
 0x155   :  { %v2401_v10 = vpop.f32.mrf.mxu0 }
 0x156   :  { %v2402_v52 = vadd.f32 %v2401_v10, %v2400_v35  ;;  %v2442_v54 = vpop.f32.mrf.mxu1 }
 0x157   :  { %v2443_v39 = vadd.f32 %v2442_v54, %v2441_v21 }
 0x158   :  { %v1069_v46 = vadd.f32 %v2402_v52, %v869_v61 }
 0x159   :  { %v2403_v57 = vpop.f32.mrf.mxu0  ;;  %v1187_v62 = vadd.f32 %v2443_v39, %v1055_v17 }
 0x15a   :  { %v2444_v19 = vpop.f32.mrf.mxu1 }
 0x15b   :  { %v2404_v50 = vpop.f32.mrf.mxu0 }
 0x15c   :  { %v2405_v44 = vadd.f32 %v2404_v50, %v2403_v57  ;;  %v2445_v42 = vpop.f32.mrf.mxu1  ;;  %v2878_v50 = vmov -inf  }
 0x15d   :  { %v2446_v11 = vadd.f32 %v2445_v42, %v2444_v19  ;;  %2118 = vst [vmem:[#allocation2] sm:$0xff] %v2878_v50  ;;  %2119 = vst [vmem:[#allocation2 + $0x1a] sm:$0xff] %v2878_v50 }
 0x15e   :  { %v1076_v49 = vadd.f32 %v2405_v44, %v880_v15  ;;  %2120 = vst [vmem:[#allocation2 + $0x22] sm:$0x3f] %v2878_v50 }
 0x15f   :  { %v2447_v34 = vpop.f32.mrf.mxu1  ;;  %v1194_v47 = vadd.f32 %v2446_v11, %v1062_v1 }
 0x161   :  { %v2448_v24 = vpop.f32.mrf.mxu1 }
 0x162   :  { %v2449_v5 = vadd.f32 %v2448_v24, %v2447_v34 }
 0x164   :  { %v2450_v45 = vpop.f32.mrf.mxu1  ;;  %v1201_v53 = vadd.f32 %v2449_v5, %v1069_v46 }
 0x166   :  { %v2451_v3 = vpop.f32.mrf.mxu1 }
 0x167   :  { %v2452_v27 = vadd.f32 %v2451_v3, %v2450_v45 }
 0x169   :  { %v1208_v30 = vadd.f32 %v2452_v27, %v1076_v49 }
 0x16d   :  { %v1298_v8 = vpop.f32.mrf.mxu0 }
 0x16e   :  { %v1299_v51 = vadd.f32 %v1298_v8, %v1180_v12 }
 0x16f   :  { %v2613_v58 = vpop.f32.mrf.mxu0 }
 0x172   :  { %v1308_v55 = vpop.f32.mrf.mxu0 }
 0x173   :  { %v1309_v40 = vadd.f32 %v1308_v55, %v1187_v62 }
 0x174   :  { %v2616_v60 = vpop.f32.mrf.mxu0 }
 0x177   :  { %v1489_v7 = vpop.f32.mrf.mxu1 }
 0x178   :  { %v1318_v32 = vpop.f32.mrf.mxu0  ;;  %v1490_v56 = vadd.f32 %v1489_v7, %v1299_v51 }
 0x179   :  { %v1319_v9 = vadd.f32 %v1318_v32, %v1194_v47  ;;  %v2660_v13 = vpop.f32.mrf.mxu1 }
 0x17a   :  { %v2619_v63 = vpop.f32.mrf.mxu0 }
 0x17d   :  { %v1328_v37 = vpop.f32.mrf.mxu0 }
 0x17e   :  { %v1329_v41 = vadd.f32 %v1328_v37, %v1201_v53  ;;  %v1495_v4 = vpop.f32.mrf.mxu1 }
 0x17f   :  { %v1496_v59 = vadd.f32 %v1495_v4, %v1309_v40  ;;  %v2622_v2 = vpop.f32.mrf.mxu0 }
 0x180   :  { %v2663_v0 = vpop.f32.mrf.mxu1 }
 0x183   :  { %v1338_v14 = vpop.f32.mrf.mxu0 }
 0x184   :  { %v1339_v61 = vadd.f32 %v1338_v14, %v1208_v30  ;;  %v1501_v48 = vpop.f32.mrf.mxu1 }
 0x185   :  { %v1502_v29 = vadd.f32 %v1501_v48, %v1319_v9  ;;  %v2625_v31 = vpop.f32.mrf.mxu0 }
 0x186   :  { %v2666_v15 = vpop.f32.mrf.mxu1 }
 0x189   :  { %v1507_v6 = vpop.f32.mrf.mxu1 }
 0x18a   :  { %v1508_v28 = vadd.f32 %v1507_v6, %v1329_v41 }
 0x18b   :  { %v2669_v16 = vpop.f32.mrf.mxu1 }
 0x18e   :  { %v1513_v23 = vpop.f32.mrf.mxu1 }
 0x18f   :  { %v1514_v22 = vadd.f32 %v1513_v23, %v1339_v61 }
 0x190   :  { %v2672_v20 = vpop.f32.mrf.mxu1 }
 0x197   :  { %v1617_v25 = vpop.f32.mrf.mxu0 }
 0x198   :  { %v1618_v27 = vadd.f32 %v1617_v25, %v1490_v56 }
 0x199   :  { %v2707_v17 = vpop.f32.mrf.mxu0 }
 0x19c   :  { %v1624_v18 = vpop.f32.mrf.mxu0 }
 0x19d   :  { %v1625_v45 = vadd.f32 %v1624_v18, %v1496_v59 }
 0x19e   :  { %v2710_v26 = vpop.f32.mrf.mxu0 }
 0x1a1   :  { %v1734_v36 = vpop.f32.mrf.mxu1 }
 0x1a2   :  { %v1631_v43 = vpop.f32.mrf.mxu0  ;;  %v1735_v55 = vadd.f32 %v1734_v36, %v1618_v27  ;;  %v2067_v27 = vlaneseq }
 0x1a3   :  { %v2754_v38 = vpop.f32.mrf.mxu1  ;;  %v1632_v30 = vadd.f32 %v1631_v43, %v1502_v29 }
 0x1a4   :  { %v2713_v33 = vpop.f32.mrf.mxu0 }
 0x1a7   :  { %v1638_v12 = vpop.f32.mrf.mxu0 }
 0x1a8   :  { %v1742_v1 = vpop.f32.mrf.mxu1  ;;  %v1639_v40 = vadd.f32 %v1638_v12, %v1508_v28 }
 0x1a9   :  { %v2716_v35 = vpop.f32.mrf.mxu0  ;;  %v1743_v8 = vadd.f32 %v1742_v1, %v1625_v45 }
 0x1aa   :  { %v2757_v21 = vpop.f32.mrf.mxu1 }
 0x1ad   :  { %v1645_v10 = vpop.f32.mrf.mxu0 }
 0x1ae   :  { %v1750_v52 = vpop.f32.mrf.mxu1  ;;  %v1646_v2 = vadd.f32 %v1645_v10, %v1514_v22 }
 0x1af   :  { %v2719_v54 = vpop.f32.mrf.mxu0  ;;  %v1751_v60 = vadd.f32 %v1750_v52, %v1632_v30  ;;  %v2068_v30 = vshrl.u32 %v2067_v27, 7 }
 0x1b0   :  { %v2760_v39 = vpop.f32.mrf.mxu1 }
 0x1b3   :  { %v1758_v46 = vpop.f32.mrf.mxu1 }
 0x1b4   :  { %v1759_v13 = vadd.f32 %v1758_v46, %v1639_v40  ;;  %v2063_v40 = vld [vmem:[%s4340_s3] sm:$0x1] }
 0x1b5   :  { %v2763_v57 = vpop.f32.mrf.mxu1 }
 0x1b8   :  { %v1766_v62 = vpop.f32.mrf.mxu1 }
 0x1b9   :  { %v1767_v48 = vadd.f32 %v1766_v62, %v1646_v2 }
 0x1ba   :  { %v2766_v19 = vpop.f32.mrf.mxu1 }
 0x1c1   :  { %v1885_v44 = vpop.f32.mrf.mxu0 }
 0x1c2   :  { %v1886_v63 = vadd.f32 %v1885_v44, %v1735_v55 }
 0x1c3   :  { %v2801_v42 = vpop.f32.mrf.mxu0 }
 0x1c5   :  { %v1891_v11 = vpop.f32.mrf.mxu0 }
 0x1c6   :  { %v1892_v7 = vadd.f32 %v1891_v11, %v1743_v8  ;;  %v2059_v8 = vld [vmem:[%s4339_s2] sm:$0x1] }
 0x1c7   :  { %v2804_v49 = vpop.f32.mrf.mxu0 }
 0x1c9   :  { %v1897_v34 = vpop.f32.mrf.mxu0  ;;  %v1996_v47 = vpop.f32.mrf.mxu1 }
 0x1ca   :  { %v1898_v37 = vadd.f32 %v1897_v34, %v1751_v60  ;;  %v1997_v0 = vadd.f32 %v1996_v47, %v1886_v63 }
 0x1cb   :  { %v2807_v24 = vpop.f32.mrf.mxu0  ;;  %v2848_v5 = vpop.f32.mrf.mxu1 }
 0x1cd   :  { %v1903_v53 = vpop.f32.mrf.mxu0  ;;  %v2002_v3 = vpop.f32.mrf.mxu1 }
 0x1ce   :  { %v4312_v41 = vadd.f32 %v2002_v3, %v1892_v7  ;;  %v1904_v56 = vadd.f32 %v1903_v53, %v1759_v13 }
 0x1cf   :  { %v2810_v51 = vpop.f32.mrf.mxu0  ;;  %v2851_v58 = vpop.f32.mrf.mxu1 }
 0x1d0   :  { %v2024_v29 = vadd.f32 %v4312_v41, %v1997_v0  ;;  %v2069_v51 = vsub.s32 0, %v2068_v30 }
 0x1d1   :  { %v1909_v32 = vpop.f32.mrf.mxu0  ;;  %v2008_v9 = vpop.f32.mrf.mxu1 }
 0x1d2   :  { %v2009_v14 = vadd.f32 %v2008_v9, %v1898_v37  ;;  %v1910_v6 = vadd.f32 %v1909_v32, %v1767_v48 }
 0x1d3   :  { %v2854_v4 = vpop.f32.mrf.mxu1  ;;  %v2813_v59 = vpop.f32.mrf.mxu0 }
 0x1d4   :  { %v2025_v28 = vadd.f32 %v2024_v29, %v2009_v14 }
 0x1d5   :  { %v2014_v61 = vpop.f32.mrf.mxu1 }
 0x1d6   :  { %v2015_v31 = vadd.f32 %v2014_v61, %v1904_v56 }
 0x1d7   :  { %v2857_v15 = vpop.f32.mrf.mxu1 }
 0x1d8   :  { %v2026_v20 = vadd.f32 %v2025_v28, %v2015_v31 }
 0x1d9   :  { %v2020_v16 = vpop.f32.mrf.mxu1 }
 0x1da   :  { %v2021_v23 = vadd.f32 %v2020_v16, %v1910_v6 }
 0x1db   :  { %v2860_v25 = vpop.f32.mrf.mxu1 }
 0x1dc   :  { %v2028_v17 = vsel %vm2027_vm5, %v2021_v23, 0.0 }
 0x1dd   :  { %v2029_v18 = vadd.f32 %v2028_v17, %v2026_v20 }
 0x1df   :  { %v2030_v22 = vrot.slane %v2029_v18, 4 }
 0x1e1   :  { %v2031_v26 = vadd.f32 %v2030_v22, %v2029_v18 }
 0x1e3   :  { %v2032_v36 = vrot.slane %v2031_v26, 2 }
 0x1e5   :  { %v2033_v43 = vadd.f32 %v2032_v36, %v2031_v26 }
 0x1e7   :  { %v2034_v38 = vrot.slane %v2033_v43, 1 }
 0x1e9   :  { %v2035_v33 = vadd.f32 %v2034_v38, %v2033_v43 }
 0x1eb   :  { %v2036_v12 = vmul.f32 0.027777778, %v2035_v33 }
 0x1ed   :  { %v2037_v1 = vsub.f32 %v1997_v0, %v2036_v12  ;;  %v2038_v35 = vsub.f32 %v4312_v41, %v2036_v12  ;;  %v2039_v21 = vsub.f32 %v2009_v14, %v2036_v12  ;;  %v2041_v10 = vsub.f32 %v2021_v23, %v2036_v12 }
 0x1ee   :  { %v2040_v52 = vsub.f32 %v2015_v31, %v2036_v12 }
 0x1ef   :  { %v2042_v54 = vmul.f32 %v2037_v1, %v2037_v1  ;;  %v2043_v39 = vmul.f32 %v2038_v35, %v2038_v35  ;;  %v2044_v46 = vmul.f32 %v2039_v21, %v2039_v21  ;;  %v2046_v62 = vmul.f32 %v2041_v10, %v2041_v10 }
 0x1f0   :  { %v2045_v19 = vmul.f32 %v2040_v52, %v2040_v52 }
 0x1f1   :  { %v2047_v57 = vadd.f32 %v2043_v39, %v2042_v54  ;;  %v2050_v42 = vsel %vm2027_vm5, %v2046_v62, 0.0 }
 0x1f3   :  { %v2048_v50 = vadd.f32 %v2047_v57, %v2044_v46 }
 0x1f5   :  { %v2049_v44 = vadd.f32 %v2048_v50, %v2045_v19 }
 0x1f7   :  { %v2051_v11 = vadd.f32 %v2050_v42, %v2049_v44 }
 0x1f9   :  { %v2052_v49 = vrot.slane %v2051_v11, 4 }
 0x1fb   :  { %v2053_v34 = vadd.f32 %v2052_v49, %v2051_v11 }
 0x1fd   :  { %v2054_v47 = vrot.slane %v2053_v34, 2 }
 0x1ff   :  { %v2055_v24 = vadd.f32 %v2054_v47, %v2053_v34 }
 0x201   :  { %v2056_v5 = vrot.slane %v2055_v24, 1 }
 0x203   :  { %v2057_v45 = vadd.f32 %v2056_v5, %v2055_v24 }
 0x205   :  { %v2058_v53 = vmul.f32 0.027777778, %v2057_v45 }
 0x207   :  { %v2060_v3 = vadd.f32 1e-05, %v2058_v53 }
 0x209   :  { %2864 = vrsqrt.f32 %v2060_v3 }
 0x216   :  { %v2865_v58 = vpop.eup %2864 }
 0x217   :  { %v2062_v55 = vmul.f32 %v2865_v58, %v2059_v8 }
 0x219   :  { %v2064_v60 = vmul.f32 %v2062_v55, %v2036_v12  ;;  %v2070_v7 = vrot.slane %v2062_v55, %v2069_v51 }
 0x21b   :  { %v2065_v32 = vsub.f32 %v2063_v40, %v2064_v60  ;;  %v2072_v9 = vmul.f32 %v2070_v7, %v1997_v0  ;;  %v2076_v13 = vmul.f32 %v2070_v7, %v2021_v23  ;;  %v2073_v63 = vmul.f32 %v2070_v7, %v4312_v41 }
 0x21c   :  { %v2074_v37 = vmul.f32 %v2070_v7, %v2009_v14  ;;  %v2075_v4 = vmul.f32 %v2070_v7, %v2015_v31 }
 0x21d   :  { %v2081_v59 = vrot.slane %v2065_v32, %v2069_v51 }
 0x21f   :  { %v2083_v2 = vadd.f32 %v2081_v59, %v2072_v9  ;;  %v2084_v56 = vadd.f32 %v2081_v59, %v2073_v63  ;;  %v2085_v61 = vadd.f32 %v2081_v59, %v2074_v37  ;;  %v2086_v48 = vadd.f32 %v2081_v59, %v2075_v4 }
 0x220   :  { %v2087_v29 = vadd.f32 %v2081_v59, %v2076_v13 }
 0x221   :  { %v2093_v15 = vmin.f32 %v2083_v2, 0.0  ;;  %v2094_v6 = vmin.f32 %v2084_v56, 0.0  ;;  %v2095_v28 = vmin.f32 %v2085_v61, 0.0  ;;  %v2096_v16 = vmin.f32 %v2086_v48, 0.0 }
 0x222   :  { %v2097_v20 = vmin.f32 %v2087_v29, 0.0  ;;  %vm2088_vm6 = vcmp.gt.f32.partialorder %v2083_v2, 0.0  ;;  %vm2089_vm7 = vcmp.gt.f32.partialorder %v2084_v56, 0.0  ;;  %vm2090_vm8 = vcmp.gt.f32.partialorder %v2085_v61, 0.0 }
 0x223   :  { %v2098_v25 = vmul.f32 1.442695, %v2093_v15  ;;  %v2100_v17 = vmul.f32 1.442695, %v2094_v6  ;;  %v2102_v18 = vmul.f32 1.442695, %v2095_v28 }
 0x224   :  { %v2104_v0 = vmul.f32 1.442695, %v2096_v16  ;;  %v2106_v41 = vmul.f32 1.442695, %v2097_v20  ;;  %vm2091_vm9 = vcmp.gt.f32.partialorder %v2086_v48, 0.0  ;;  %vm2092_vm10 = vcmp.gt.f32.partialorder %v2087_v29, 0.0 }
 0x225   :  { %2866 = vpow2.f32 %v2098_v25 }
 0x226   :  { %2868 = vpow2.f32 %v2100_v17 }
 0x227   :  { %2870 = vpow2.f32 %v2102_v18 }
 0x228   :  { %2872 = vpow2.f32 %v2104_v0 }
 0x229   :  { %2874 = vpow2.f32 %v2106_v41 }
 0x232   :  { %v2867_v14 = vpop.eup %2866 }
 0x233   :  { %v2869_v31 = vpop.eup %2868  ;;  %v2164_v23 = vadd.f32 -1.0, %v2867_v14 }
 0x234   :  { %v2871_v22 = vpop.eup %2870  ;;  %v2165_v26 = vadd.f32 -1.0, %v2869_v31 }
 0x235   :  { %v2166_v36 = vadd.f32 -1.0, %v2871_v22  ;;  %v2113_v43 = vsel %vm2088_vm6, %v2083_v2, %v2164_v23  ;;  %v2873_v33 = vpop.eup %2872 }
 0x236   :  { %v2114_v38 = vsel %vm2089_vm7, %v2084_v56, %v2165_v26  ;;  %2121 = vst [vmem:[#allocation2 + $0x8] sm:$0xff] %v2113_v43  ;;  %v2875_v1 = vpop.eup %2874  ;;  %v2167_v35 = vadd.f32 -1.0, %v2873_v33 }
 0x237   :  { %v2115_v12 = vsel %vm2090_vm8, %v2085_v61, %v2166_v36  ;;  %2122 = vst [vmem:[#allocation2 + $0x10] sm:$0xff] %v2114_v38  ;;  %v2168_v21 = vadd.f32 -1.0, %v2875_v1 }
 0x238   :  { %2123 = vst [vmem:[#allocation2 + $0x18] sm:$0x3] %v2115_v12  ;;  %v2116_v10 = vsel %vm2091_vm9, %v2086_v48, %v2167_v35 }
 0x239   :  { %v2117_v46 = vsel %vm2092_vm10, %v2087_v29, %v2168_v21 }
 0x23e   :  { %v2125_v52 = vld [vmem:[#allocation2 + $0x7] ss:$2 sm:$0xff]  ;;  %v2129_v54 = vld [vmem:[#allocation2 + $0x8] ss:$2 sm:$0xff] }
 0x23f   :  { %v2133_v39 = vld [vmem:[#allocation2 + $0x9] ss:$2 sm:$0xff]  ;;  %v2131_v62 = vld [vmem:[#allocation2 + $0x18] ss:$2 sm:$0xff]  ;;  %v2135_v19 = vld [vmem:[#allocation2 + $0x19] ss:$2 sm:$0xff]  ;;  %v2136_v50 = vmax.f32 %v2125_v52, %v2129_v54 }
 0x240   :  { %v2127_v57 = vld [vmem:[#allocation2 + $0x17] ss:$2 sm:$0xff]  ;;  %2142 = vst [vmem:[#allocation2 + $0x6] sm:$0xfc] %v2115_v12  ;;  %2143 = vst [vmem:[#allocation2 + $0xe] sm:$0xff] %v2116_v10 }
 0x241   :  { %v2137_v44 = vmax.f32 %v2127_v57, %v2131_v62  ;;  %2144 = vst [vmem:[#allocation2 + $0x16] sm:$0xf] %v2117_v46  ;;  %v2138_v42 = vmax.f32 %v2136_v50, %v2133_v39 }
 0x243   :  { %v2139_v11 = vmax.f32 %v2137_v44, %v2135_v19  ;;  %2140 = vst [vmem:[%s4341_s4] sm:$0xff] %v2138_v42 }
 0x245   :  { %2141 = vst [vmem:[%s4341_s4 + $0x8] sm:$0xff] %v2139_v11 }
 0x247   :  { %v2145_v49 = vld [vmem:[#allocation2 + $0x7] ss:$2 sm:$0xff] }
 0x248   :  { %v2146_v34 = vld [vmem:[#allocation2 + $0x17] ss:$2 sm:$0xff]  ;;  %v2147_v47 = vld [vmem:[#allocation2 + $0x8] ss:$2 sm:$0xff]  ;;  %v2148_v24 = vld [vmem:[#allocation2 + $0x18] ss:$2 sm:$0xff] }
 0x249   :  { %v2151_v5 = vmax.f32 %v2145_v49, %v2147_v47  ;;  %v2152_v45 = vmax.f32 %v2146_v34, %v2148_v24  ;;  %v2149_v53 = vld [vmem:[#allocation2 + $0x9] ss:$2 sm:$0xff]  ;;  %v2150_v3 = vld [vmem:[#allocation2 + $0x19] ss:$2 sm:$0xff] }
 0x24b   :  { %v2153_v27 = vmax.f32 %v2151_v5, %v2149_v53  ;;  %v2154_v30 = vmax.f32 %v2152_v45, %v2150_v3 }
 0x24d   :  { %2169 = vst [vmem:[%s4341_s4 + $0x10] sm:$0xff] %v2153_v27  ;;  %2170 = vst [vmem:[%s4341_s4 + $0x18] sm:$0xff] %v2154_v30 }

</bundles_post_ra>
